<compile_context>
chip_gen: v7x
topology: tpu7x:2x2x1
jax: 0.10.0
libtpu: 0.0.40
codegen_flags: <defaults>
</compile_context>

<pallas_src>
import functools

import jax
import jax.numpy as jnp
from jax import lax
from jax.experimental import pallas as pl
from jax.experimental.pallas import tpu as pltpu


def _round_up(x, m):
    return ((x + m - 1) // m) * m


# ---------------------------------------------------------------------------
# Kernel A: tiled  (M, K) @ (K, N) + bias  ->  (M, N)
# Used for both hoisted projections.  Grid = (row tiles, col tiles), both
# "parallel" (megacore-shardable on v7x).  K (= E or H_pad) is kept whole per
# block; it is small enough to sit in VMEM.
# ---------------------------------------------------------------------------
def _matmul_bias_kernel(a_ref, b_ref, bias_ref, o_ref):
    o_ref[...] = (
        jnp.dot(a_ref[...], b_ref[...], preferred_element_type=jnp.float32)
        + bias_ref[...]
    )


def _matmul_bias(a, b, bias, *, tm=128):
    M, K = a.shape
    Kb, N = b.shape
    assert K == Kb and bias.shape == (1, N)
    assert N % 128 == 0, "pad N to a lane multiple before calling"

    Mp = _round_up(M, tm)
    if Mp != M:
        a = jnp.pad(a, ((0, Mp - M), (0, 0)))
    tn = next(t for t in (512, 256, 128) if N % t == 0)

    out = pl.pallas_call(
        _matmul_bias_kernel,
        out_shape=jax.ShapeDtypeStruct((Mp, N), jnp.float32),
        grid=(Mp // tm, N // tn),
        in_specs=[
            pl.BlockSpec((tm, K), lambda i, j: (i, 0)),
            pl.BlockSpec((K, tn), lambda i, j: (0, j)),
            pl.BlockSpec((1, tn), lambda i, j: (0, j)),
        ],
        out_specs=pl.BlockSpec((tm, tn), lambda i, j: (i, j)),
        compiler_params=pltpu.CompilerParams(
            dimension_semantics=("parallel", "parallel"),
            vmem_limit_bytes=64 * 1024 * 1024,
        ),
    )(a, b, bias)
    return out[:M]


# ---------------------------------------------------------------------------
# Kernel B: sequential LSTM recurrence.
# Single grid point; lax.fori_loop over T inside the kernel (no per-step grid
# pipeline overhead).  Per step only  h_prev @ W_hh  hits the MXU; the input
# projection was hoisted.  Gate order is (i, f, g, o) like torch.nn.LSTM, and
# each gate slice is H_pad (a multiple of 128) lanes wide.
# ---------------------------------------------------------------------------
def _lstm_recurrence_kernel(gx_ref, whh_ref, h_out_ref, *, seq_len, hidden_pad):
    Hp = hidden_pad
    Bp = h_out_ref.shape[1]

    def step(t, carry):
        h_prev, c_prev = carry
        gates = gx_ref[t] + jnp.dot(
            h_prev, whh_ref[...], preferred_element_type=jnp.float32)   # (Bp, 4*Hp)
        i_g = jax.nn.sigmoid(gates[:, 0 * Hp:1 * Hp])
        f_g = jax.nn.sigmoid(gates[:, 1 * Hp:2 * Hp])
        g_g = jnp.tanh(gates[:, 2 * Hp:3 * Hp])
        o_g = jax.nn.sigmoid(gates[:, 3 * Hp:4 * Hp])
        c_new = f_g * c_prev + i_g * g_g
        h_new = o_g * jnp.tanh(c_new)
        h_out_ref[t] = h_new
        return h_new, c_new

    # torch.nn.LSTM default initial state is zeros when none is passed.
    h0 = jnp.zeros((Bp, Hp), jnp.float32)
    c0 = jnp.zeros((Bp, Hp), jnp.float32)
    lax.fori_loop(0, seq_len, step, (h0, c0))


def _lstm_recurrence(gates_x, w_hh):
    T, Bp, G = gates_x.shape
    Hp = w_hh.shape[0]
    assert G == 4 * Hp
    kernel = functools.partial(_lstm_recurrence_kernel, seq_len=T, hidden_pad=Hp)
    return pl.pallas_call(
        kernel,
        out_shape=jax.ShapeDtypeStruct((T, Bp, Hp), jnp.float32),
        grid=(1,),
        in_specs=[
            pl.BlockSpec((T, Bp, G), lambda i: (0, 0, 0)),   # gates_x, VMEM resident
            pl.BlockSpec((Hp, G), lambda i: (0, 0)),          # W_hh
        ],
        out_specs=pl.BlockSpec((T, Bp, Hp), lambda i: (0, 0, 0)),
        compiler_params=pltpu.CompilerParams(
            # Time recurrence is inherently sequential; must NOT be sharded.
            dimension_semantics=("arbitrary",),
            vmem_limit_bytes=64 * 1024 * 1024,
        ),
    )(gates_x, w_hh)


# ---------------------------------------------------------------------------
# Wrapper: embedding gather + feature concat (plain-JAX glue), padding, and
# the three-stage pipeline above.
# ---------------------------------------------------------------------------
def decoder_rnn_forward(features, captions, params):
    """features: (B, E) float32, captions: (B, L) int32. Returns (B, L, V) logits."""
    emb = params["embedding"]                        # (V, E)
    w_ih = params["w_ih"]                            # (E, 4H)  gate order i,f,g,o
    w_hh = params["w_hh"]                            # (H, 4H)
    bias = params["bias"]                            # (1, 4H)  (= b_ih + b_hh)
    w_out = params["w_out"]                          # (H, V)
    b_out = params["b_out"]                          # (1, V)

    B, E = features.shape
    H = w_hh.shape[0]
    V = w_out.shape[1]

    # Glue (plain JAX): embedding gather + concat image feature as step 0.
    cap_emb = jnp.take(emb, captions[:, :-1], axis=0)             # (B, L-1, E)
    x = jnp.concatenate([features[:, None, :], cap_emb], axis=1)  # (B, T, E)
    T = x.shape[1]

    # TPU-friendly padded sizes.
    Bp = _round_up(B, 8)       # sublane multiple
    Hp = _round_up(H, 128)     # lane multiple -> gate slices are full lane tiles
    Vp = _round_up(V, 128)     # lane-dense logit stores

    x_tm = jnp.transpose(x, (1, 0, 2))                            # (T, B, E) time-major
    if Bp != B:
        x_tm = jnp.pad(x_tm, ((0, 0), (0, Bp - B), (0, 0)))

    # Pad each gate block (i|f|g|o) from H to Hp so the concatenated gate order
    # is preserved.  Padded gate columns/rows are all-zero -> padded h/c stay 0.
    def pad_gate_cols(w):
        parts = jnp.split(w, 4, axis=-1)
        pad = [(0, 0)] * (w.ndim - 1) + [(0, Hp - H)]
        return jnp.concatenate([jnp.pad(p, pad) for p in parts], axis=-1)

    w_ih_p = pad_gate_cols(w_ih)                                           # (E, 4Hp)
    bias_p = pad_gate_cols(bias)                                           # (1, 4Hp)
    w_hh_p = pad_gate_cols(jnp.pad(w_hh, ((0, Hp - H), (0, 0))))           # (Hp, 4Hp)
    w_out_p = jnp.pad(w_out, ((0, Hp - H), (0, Vp - V)))                   # (Hp, Vp)
    b_out_p = jnp.pad(b_out, ((0, 0), (0, Vp - V)))                        # (1, Vp)

    # 1) Hoisted input projection: ONE matmul over all timesteps.
    gates_x = _matmul_bias(x_tm.reshape(T * Bp, E), w_ih_p, bias_p)        # (T*Bp, 4Hp)
    gates_x = gates_x.reshape(T, Bp, 4 * Hp)

    # 2) Sequential LSTM recurrence (only h @ W_hh on the critical path).
    h_all = _lstm_recurrence(gates_x, w_hh_p)                              # (T, Bp, Hp)

    # 3) Hoisted vocab projection: ONE lane-dense matmul.
    logits = _matmul_bias(h_all.reshape(T * Bp, Hp), w_out_p, b_out_p)     # (T*Bp, Vp)
    logits = logits.reshape(T, Bp, Vp)[:, :B, :V]                          # strip padding

    return jnp.transpose(logits, (1, 0, 2))                                # (B, T, V)


# ---------------------------------------------------------------------------
# Parameter init (matching torch.nn.LSTM / Linear layouts, transposed weights).
# ---------------------------------------------------------------------------
def init_params(key, embed_size, hidden_size, vocab_size):
    k = jax.random.split(key, 7)
    s = 1.0 / jnp.sqrt(hidden_size)
    return {
        "embedding": jax.random.normal(k[0], (vocab_size, embed_size), jnp.float32),
        "w_ih": jax.random.uniform(k[1], (embed_size, 4 * hidden_size),
                                   jnp.float32, -s, s),
        "w_hh": jax.random.uniform(k[2], (hidden_size, 4 * hidden_size),
                                   jnp.float32, -s, s),
        "bias": jax.random.uniform(k[3], (1, 4 * hidden_size),
                                   jnp.float32, -s, s),   # combined b_ih + b_hh
        "w_out": jax.random.uniform(k[4], (hidden_size, vocab_size),
                                    jnp.float32, -s, s),
        "b_out": jax.random.uniform(k[5], (1, vocab_size),
                                    jnp.float32, -s, s),
    }


# Pure-JAX reference (same math, lax.scan) for a correctness check.
def _reference_forward(features, captions, params):
    emb, w_ih, w_hh = params["embedding"], params["w_ih"], params["w_hh"]
    bias, w_out, b_out = params["bias"], params["w_out"], params["b_out"]
    H = w_hh.shape[0]
    cap_emb = jnp.take(emb, captions[:, :-1], axis=0)
    x = jnp.concatenate([features[:, None, :], cap_emb], axis=1)

    def step(carry, x_t):
        h, c = carry
        g = x_t @ w_ih + h @ w_hh + bias
        i = jax.nn.sigmoid(g[:, :H])
        f = jax.nn.sigmoid(g[:, H:2 * H])
        gg = jnp.tanh(g[:, 2 * H:3 * H])
        o = jax.nn.sigmoid(g[:, 3 * H:])
        c = f * c + i * gg
        h = o * jnp.tanh(c)
        return (h, c), h

    B = features.shape[0]
    h0 = jnp.zeros((B, H), jnp.float32)
    (_, _), hs = lax.scan(step, (h0, jnp.zeros_like(h0)), jnp.transpose(x, (1, 0, 2)))
    logits = hs @ w_out + b_out
    return jnp.transpose(logits, (1, 0, 2))


if __name__ == "__main__":
    embed_size = 32
    hidden_size = 32
    vocab_size = 64
    batch = 2
    caption_len = 8   # sequence length T == caption_len (drop last token, prepend feature)

    key = jax.random.PRNGKey(0)
    k_param, k_feat, k_cap = jax.random.split(key, 3)

    params = init_params(k_param, embed_size, hidden_size, vocab_size)
    features = jax.random.normal(k_feat, (batch, embed_size), jnp.float32)
    captions = jax.random.randint(k_cap, (batch, caption_len), 0, vocab_size,
                                  dtype=jnp.int32)

    fwd = jax.jit(decoder_rnn_forward)
    logits = fwd(features, captions, params)
    jax.block_until_ready(logits)

    assert logits.shape == (batch, caption_len, vocab_size)
    assert logits.dtype == jnp.float32

    ref = _reference_forward(features, captions, params)
    assert float(jnp.max(jnp.abs(logits - ref))) < 5e-2

    print("KERNEL_OK")
</pallas_src>

<mosaic_0001>
module attributes {stable_mosaic.version = 11 : i64} {
  func.func @_matmul_bias_kernel(%arg0: i32, %arg1: i32, %arg2: memref<128x32xf32, #tpu.memory_space<vmem>>, %arg3: memref<32x512xf32, #tpu.memory_space<vmem>>, %arg4: memref<1x512xf32, #tpu.memory_space<vmem>>, %arg5: memref<128x512xf32, #tpu.memory_space<vmem>>) attributes {dimension_semantics = [#tpu.dimension_semantics<parallel>, #tpu.dimension_semantics<parallel>], iteration_bounds = array<i64: 1, 1>, scalar_prefetch = 0 : i64, scratch_operands = 0 : i64, tpu.core_type = #tpu.core_type<tc>, window_params = [{transform_indices = @transform_0, window_bounds = array<i64: 128, 32>}, {transform_indices = @transform_1, window_bounds = array<i64: 32, 512>}, {transform_indices = @transform_2, window_bounds = array<i64: 1, 512>}, {transform_indices = @transform_3, window_bounds = array<i64: 128, 512>}]} {
    %c0 = arith.constant 0 : index
    %c0_0 = arith.constant 0 : index
    %0 = vector.load %arg2[%c0, %c0_0] : memref<128x32xf32, #tpu.memory_space<vmem>>, vector<128x32xf32>
    %c0_1 = arith.constant 0 : index
    %c0_2 = arith.constant 0 : index
    %1 = vector.load %arg3[%c0_1, %c0_2] : memref<32x512xf32, #tpu.memory_space<vmem>>, vector<32x512xf32>
    %cst = arith.constant dense<0.000000e+00> : vector<128x512xf32>
    %2 = tpu.matmul %0, %1, %cst {dimension_numbers = #tpu.dot_dimension_numbers<[1], [0], [0], [1], [0, 0, 1, 1], [], []>} : vector<128x32xf32>, vector<32x512xf32>, vector<128x512xf32> -> vector<128x512xf32>
    %c0_3 = arith.constant 0 : index
    %c0_4 = arith.constant 0 : index
    %3 = vector.load %arg4[%c0_3, %c0_4] : memref<1x512xf32, #tpu.memory_space<vmem>>, vector<1x512xf32>
    %4 = vector.broadcast %3 : vector<1x512xf32> to vector<128x512xf32>
    %5 = arith.addf %2, %4 : vector<128x512xf32>
    %c0_5 = arith.constant 0 : index
    %c0_6 = arith.constant 0 : index
    %6 = vector.load %arg5[%c0_5, %c0_6] : memref<128x512xf32, #tpu.memory_space<vmem>>, vector<128x512xf32>
    tpu.vector_store %arg5[%c0_5, %c0_6], %5 {strides = array<i32>} : memref<128x512xf32, #tpu.memory_space<vmem>>, vector<128x512xf32>,
    return
  }
  func.func @transform_0(%arg0: i32, %arg1: i32) -> (i32, i32) {
    %c0_i32 = arith.constant 0 : i32
    %c0_i32_0 = arith.constant 0 : i32
    return %arg0, %c0_i32 : i32, i32
  }
  func.func @transform_1(%arg0: i32, %arg1: i32) -> (i32, i32) {
    %c0_i32 = arith.constant 0 : i32
    %c0_i32_0 = arith.constant 0 : i32
    return %c0_i32, %arg1 : i32, i32
  }
  func.func @transform_2(%arg0: i32, %arg1: i32) -> (i32, i32) {
    %c0_i32 = arith.constant 0 : i32
    %c0_i32_0 = arith.constant 0 : i32
    return %c0_i32, %arg1 : i32, i32
  }
  func.func @transform_3(%arg0: i32, %arg1: i32) -> (i32, i32) {
    %c0_i32 = arith.constant 0 : i32
    return %arg0, %arg1 : i32, i32
  }
}

module attributes {stable_mosaic.version = 11 : i64} {
  func.func @_lstm_recurrence_kernel(%arg0: i32, %arg1: memref<8x8x512xf32, #tpu.memory_space<vmem>>, %arg2: memref<128x512xf32, #tpu.memory_space<vmem>>, %arg3: memref<8x8x128xf32, #tpu.memory_space<vmem>>) attributes {dimension_semantics = [#tpu.dimension_semantics<arbitrary>], iteration_bounds = array<i64: 1>, scalar_prefetch = 0 : i64, scratch_operands = 0 : i64, tpu.core_type = #tpu.core_type<tc>, window_params = [{pipeline_mode = #tpu.pipeline_mode<synchronous>, transform_indices = @transform_0, window_bounds = array<i64: 8, 8, 512>}, {pipeline_mode = #tpu.pipeline_mode<synchronous>, transform_indices = @transform_1, window_bounds = array<i64: 128, 512>}, {pipeline_mode = #tpu.pipeline_mode<synchronous>, transform_indices = @transform_2, window_bounds = array<i64: 8, 8, 128>}]} {
    %cst = arith.constant 0.000000e+00 : f32
    %0 = vector.broadcast %cst : f32 to vector<8x128xf32>
    %cst_0 = arith.constant 0.000000e+00 : f32
    %1 = vector.broadcast %cst_0 : f32 to vector<8x128xf32>
    %c0_i32 = arith.constant 0 : i32
    %c8_i32 = arith.constant 8 : i32
    %2 = arith.addi %c0_i32, %c8_i32 : i32
    %c1_i32 = arith.constant 1 : i32
    %3:2 = scf.for %arg4 = %c0_i32 to %2 step %c1_i32 iter_args(%arg5 = %0, %arg6 = %1) -> (vector<8x128xf32>, vector<8x128xf32>)  : i32 {
      %4 = arith.index_cast %arg4 : i32 to index
      %c0 = arith.constant 0 : index
      %c0_2 = arith.constant 0 : index
      %5 = vector.load %arg1[%4, %c0, %c0_2] : memref<8x8x512xf32, #tpu.memory_space<vmem>>, vector<1x8x512xf32>
      %6 = vector.shape_cast %5 : vector<1x8x512xf32> to vector<8x512xf32>
      %c0_3 = arith.constant 0 : index
      %c0_4 = arith.constant 0 : index
      %7 = vector.load %arg2[%c0_3, %c0_4] : memref<128x512xf32, #tpu.memory_space<vmem>>, vector<128x512xf32>
      %cst_5 = arith.constant dense<0.000000e+00> : vector<8x512xf32>
      %8 = tpu.matmul %arg5, %7, %cst_5 {dimension_numbers = #tpu.dot_dimension_numbers<[1], [0], [0], [1], [0, 0, 1, 1], [], []>} : vector<8x128xf32>, vector<128x512xf32>, vector<8x512xf32> -> vector<8x512xf32>
      %9 = arith.addf %6, %8 : vector<8x512xf32>
      %10 = vector.extract_strided_slice %9 {offsets = [0, 0], sizes = [8, 128], strides = [1, 1]} : vector<8x512xf32> to vector<8x128xf32>
      %11 = arith.negf %10 : vector<8x128xf32>
      %12 = math.exp %11 : vector<8x128xf32>
      %cst_6 = arith.constant 1.000000e+00 : f32
      %13 = vector.broadcast %cst_6 : f32 to vector<8x128xf32>
      %14 = arith.addf %13, %12 : vector<8x128xf32>
      %15 = arith.divf %13, %14 : vector<8x128xf32>
      %16 = vector.extract_strided_slice %9 {offsets = [0, 128], sizes = [8, 128], strides = [1, 1]} : vector<8x512xf32> to vector<8x128xf32>
      %17 = arith.negf %16 : vector<8x128xf32>
      %18 = math.exp %17 : vector<8x128xf32>
      %cst_7 = arith.constant 1.000000e+00 : f32
      %19 = vector.broadcast %cst_7 : f32 to vector<8x128xf32>
      %20 = arith.addf %19, %18 : vector<8x128xf32>
      %21 = arith.divf %19, %20 : vector<8x128xf32>
      %22 = vector.extract_strided_slice %9 {offsets = [0, 256], sizes = [8, 128], strides = [1, 1]} : vector<8x512xf32> to vector<8x128xf32>
      %23 = math.tanh %22 : vector<8x128xf32>
      %24 = vector.extract_strided_slice %9 {offsets = [0, 384], sizes = [8, 128], strides = [1, 1]} : vector<8x512xf32> to vector<8x128xf32>
      %25 = arith.negf %24 : vector<8x128xf32>
      %26 = math.exp %25 : vector<8x128xf32>
      %cst_8 = arith.constant 1.000000e+00 : f32
      %27 = vector.broadcast %cst_8 : f32 to vector<8x128xf32>
      %28 = arith.addf %27, %26 : vector<8x128xf32>
      %29 = arith.divf %27, %28 : vector<8x128xf32>
      %30 = arith.mulf %21, %arg6 : vector<8x128xf32>
      %31 = arith.mulf %15, %23 : vector<8x128xf32>
      %32 = arith.addf %30, %31 : vector<8x128xf32>
      %33 = math.tanh %32 : vector<8x128xf32>
      %34 = arith.mulf %29, %33 : vector<8x128xf32>
      %35 = arith.index_cast %arg4 : i32 to index
      %c0_9 = arith.constant 0 : index
      %c0_10 = arith.constant 0 : index
      %36 = vector.load %arg3[%35, %c0_9, %c0_10] : memref<8x8x128xf32, #tpu.memory_space<vmem>>, vector<1x8x128xf32>
      %37 = vector.shape_cast %36 : vector<1x8x128xf32> to vector<8x128xf32>
      %38 = vector.shape_cast %34 : vector<8x128xf32> to vector<1x8x128xf32>
      tpu.vector_store %arg3[%35, %c0_9, %c0_10], %38 {strides = array<i32>} : memref<8x8x128xf32, #tpu.memory_space<vmem>>, vector<1x8x128xf32>,
      scf.yield %34, %32 : vector<8x128xf32>, vector<8x128xf32>
    }
    %c8_i32_1 = arith.constant 8 : i32
    return
  }
  func.func @transform_0(%arg0: i32) -> (i32, i32, i32) {
    %c0_i32 = arith.constant 0 : i32
    %c0_i32_0 = arith.constant 0 : i32
    %c0_i32_1 = arith.constant 0 : i32
    %c0_i32_2 = arith.constant 0 : i32
    return %c0_i32, %c0_i32_0, %c0_i32_1 : i32, i32, i32
  }
  func.func @transform_1(%arg0: i32) -> (i32, i32) {
    %c0_i32 = arith.constant 0 : i32
    %c0_i32_0 = arith.constant 0 : i32
    %c0_i32_1 = arith.constant 0 : i32
    return %c0_i32, %c0_i32_0 : i32, i32
  }
  func.func @transform_2(%arg0: i32) -> (i32, i32, i32) {
    %c0_i32 = arith.constant 0 : i32
    %c0_i32_0 = arith.constant 0 : i32
    %c0_i32_1 = arith.constant 0 : i32
    %c0_i32_2 = arith.constant 0 : i32
    return %c0_i32, %c0_i32_0, %c0_i32_1 : i32, i32, i32
  }
}

module attributes {stable_mosaic.version = 11 : i64} {
  func.func @_matmul_bias_kernel(%arg0: i32, %arg1: i32, %arg2: memref<128x128xf32, #tpu.memory_space<vmem>>, %arg3: memref<128x128xf32, #tpu.memory_space<vmem>>, %arg4: memref<1x128xf32, #tpu.memory_space<vmem>>, %arg5: memref<128x128xf32, #tpu.memory_space<vmem>>) attributes {dimension_semantics = [#tpu.dimension_semantics<parallel>, #tpu.dimension_semantics<parallel>], iteration_bounds = array<i64: 1, 1>, scalar_prefetch = 0 : i64, scratch_operands = 0 : i64, tpu.core_type = #tpu.core_type<tc>, window_params = [{transform_indices = @transform_0, window_bounds = array<i64: 128, 128>}, {transform_indices = @transform_1, window_bounds = array<i64: 128, 128>}, {transform_indices = @transform_2, window_bounds = array<i64: 1, 128>}, {transform_indices = @transform_3, window_bounds = array<i64: 128, 128>}]} {
    %c0 = arith.constant 0 : index
    %c0_0 = arith.constant 0 : index
    %0 = vector.load %arg2[%c0, %c0_0] : memref<128x128xf32, #tpu.memory_space<vmem>>, vector<128x128xf32>
    %c0_1 = arith.constant 0 : index
    %c0_2 = arith.constant 0 : index
    %1 = vector.load %arg3[%c0_1, %c0_2] : memref<128x128xf32, #tpu.memory_space<vmem>>, vector<128x128xf32>
    %cst = arith.constant dense<0.000000e+00> : vector<128x128xf32>
    %2 = tpu.matmul %0, %1, %cst {dimension_numbers = #tpu.dot_dimension_numbers<[1], [0], [0], [1], [0, 0, 1, 1], [], []>} : vector<128x128xf32>, vector<128x128xf32>, vector<128x128xf32> -> vector<128x128xf32>
    %c0_3 = arith.constant 0 : index
    %c0_4 = arith.constant 0 : index
    %3 = vector.load %arg4[%c0_3, %c0_4] : memref<1x128xf32, #tpu.memory_space<vmem>>, vector<1x128xf32>
    %4 = vector.broadcast %3 : vector<1x128xf32> to vector<128x128xf32>
    %5 = arith.addf %2, %4 : vector<128x128xf32>
    %c0_5 = arith.constant 0 : index
    %c0_6 = arith.constant 0 : index
    %6 = vector.load %arg5[%c0_5, %c0_6] : memref<128x128xf32, #tpu.memory_space<vmem>>, vector<128x128xf32>
    tpu.vector_store %arg5[%c0_5, %c0_6], %5 {strides = array<i32>} : memref<128x128xf32, #tpu.memory_space<vmem>>, vector<128x128xf32>,
    return
  }
  func.func @transform_0(%arg0: i32, %arg1: i32) -> (i32, i32) {
    %c0_i32 = arith.constant 0 : i32
    %c0_i32_0 = arith.constant 0 : i32
    return %arg0, %c0_i32 : i32, i32
  }
  func.func @transform_1(%arg0: i32, %arg1: i32) -> (i32, i32) {
    %c0_i32 = arith.constant 0 : i32
    %c0_i32_0 = arith.constant 0 : i32
    return %c0_i32, %arg1 : i32, i32
  }
  func.func @transform_2(%arg0: i32, %arg1: i32) -> (i32, i32) {
    %c0_i32 = arith.constant 0 : i32
    %c0_i32_0 = arith.constant 0 : i32
    return %c0_i32, %arg1 : i32, i32
  }
  func.func @transform_3(%arg0: i32, %arg1: i32) -> (i32, i32) {
    %c0_i32 = arith.constant 0 : i32
    return %arg0, %arg1 : i32, i32
  }
}

</mosaic_0001>

<bundles_post_ra>
// kernel: decoder_rnn_forward.5
= control target key start
LH: loop header
LB: loop body
LE: loop exit
PB: predicated region body
PF: predicated region fallthrough
CT: control target
= control target key end

     0   :  { %8 = vsyncpa [#allocation3], 0  ;;  %s599_s0 = inlined_call_operand.hbm [shape: f32[128,128], index: 0, kind: input, shape index: {}]   ;;  %s600_s1 = inlined_call_operand.hbm [shape: f32[128,128], index: 1, kind: input, shape index: {}]   ;;  %s601_s2 = inlined_call_operand.hbm [shape: f32[1,128], index: 2, kind: input, shape index: {}]   ;;  %s602_s3 = inlined_call_operand.hbm [shape: f32[128,128], index: 3, kind: output, shape index: {}]  }
   0x1   :  { %9 = vsyncpa [#allocation6], 0 }
   0x2   :  { %10 = vsyncpa [#allocation4], 0  ;;  %s509_s12 = smov [#allocation5]   ;;  %s510_s14 = smov [#allocation2]  }
   0x3   :  { %s28_s13 = sshll.u32 %s509_s12, 4  ;;  %s16_s15 = sshll.u32 %s510_s14, 4  ;;  %s29_s13 = int_to_ptr.vmem [resolvable:$true] %s28_s13  ;;  %s535_s15 = int_to_ptr.vmem [resolvable:$true] %s16_s15 }
   0x4   :  { %s415_s18 = scalar_lea.hbm %s600_s1, 2048 }
   0x5   :  { %p416_p0 = scmp.ne.s32.totalorder %s600_s1, %s415_s18  ;;  %p419_p1 = scmp.lt.u32.totalorder %s415_s18, %s600_s1 }
   0x7   :  { %p421_p2 = pnand %p419_p1, %p416_p0 }
   0x9   :  { %424 = shalt.err (!%p421_p2)
}
   0xa   :  { %s425_s23 = scalar_lea.vmem %s29_s13, 2048  ;;  %p430_p4 = scmp.lt.s32.totalorder %s29_s13, %s29_s13 }
   0xb   :  { %p426_p3 = scmp.ne.s32.totalorder %s29_s13, %s425_s23  ;;  %p431_p5 = scmp.lt.s32.totalorder %s425_s23, %s425_s23 }
   0xd   :  { %p432_p6 = por %p431_p5, %p430_p4 }
   0xf   :  { %p433_p7 = pnand %p432_p6, %p426_p3 }
  0x11   :  { %436 = shalt.err (!%p433_p7)
}
  0x12   :  { %s511_s24 = smov 128   ;;  %s512_s25 = smov 8  }
  0x13   :  { %34 = dma.hbm_to_vmem [thread:$0]  %s600_s1, 2048, %s29_s13, [#allocation6], %s511_s24, %s511_s24, %s512_s25  }
  0x14   :  { %s437_s30 = scalar_lea.hbm %s599_s0, 2048 }
  0x15   :  { %p438_p8 = scmp.ne.s32.totalorder %s599_s0, %s437_s30  ;;  %p441_p9 = scmp.lt.u32.totalorder %s437_s30, %s599_s0 }
  0x17   :  { %p443_p10 = pnand %p441_p9, %p438_p8 }
  0x19   :  { %446 = shalt.err (!%p443_p10)
}
  0x1a   :  { %s447_s8 = scalar_lea.vmem %s535_s15, 2048  ;;  %p452_p12 = scmp.lt.s32.totalorder %s535_s15, %s535_s15 }
  0x1b   :  { %p448_p11 = scmp.ne.s32.totalorder %s535_s15, %s447_s8  ;;  %p453_p13 = scmp.lt.s32.totalorder %s447_s8, %s447_s8 }
  0x1d   :  { %p454_p0 = por %p453_p13, %p452_p12 }
  0x1f   :  { %p455_p1 = pnand %p454_p0, %p448_p11 }
  0x21   :  { %458 = shalt.err (!%p455_p1)
}
  0x22   :  { %22 = dma.hbm_to_vmem [thread:$0]  %s599_s0, 2048, %s535_s15, [#allocation3], %s511_s24, %s511_s24, %s512_s25  }
  0x23   :  { %s513_s10 = smov [#allocation7]   ;;  %s459_s14 = scalar_lea.hbm %s601_s2, 16 }
  0x24   :  { %s41_s11 = sshll.u32 %s513_s10, 4  ;;  %p460_p2 = scmp.ne.s32.totalorder %s601_s2, %s459_s14  ;;  %s42_s11 = int_to_ptr.vmem [resolvable:$true] %s41_s11 }
  0x25   :  { %p463_p3 = scmp.lt.u32.totalorder %s459_s14, %s601_s2 }
  0x27   :  { %p465_p4 = pnand %p463_p3, %p460_p2 }
  0x29   :  { %468 = shalt.err (!%p465_p4)
}
  0x2a   :  { %s469_s20 = scalar_lea.vmem %s42_s11, 16  ;;  %s473_s0 = scalar_lea.vmem %s42_s11, 32 }
  0x2b   :  { %p470_p5 = scmp.ne.s32.totalorder %s42_s11, %s469_s20  ;;  %p474_p6 = scmp.lt.s32.totalorder %s42_s11, %s42_s11 }
  0x2c   :  { %p475_p7 = scmp.lt.s32.totalorder %s473_s0, %s469_s20 }
  0x2e   :  { %p476_p8 = por %p475_p7, %p474_p6 }
  0x30   :  { %p477_p9 = pnand %p476_p8, %p470_p5 }
  0x32   :  { %480 = shalt.err (!%p477_p9)
}
  0x33   :  { %44 = dma.hbm_to_vmem [thread:$0]  %s601_s2, 16, %s42_s11, [#allocation6]  }
  0x34   :  { %503 = dma.done.wait [#allocation3], 2048  }
  0x35   :  { %504 = vsyncadd [#allocation3], 4294965248 }
  0x36   :  { %505 = dma.done.wait [#allocation6], 2064  }
  0x37   :  { %506 = vsyncadd [#allocation6], 4294965232  ;;  %v70_v0 = vld [vmem:[#allocation5] sm:$0xff]  ;;  %v71_v1 = vld [vmem:[#allocation5 + $0x8] sm:$0xff]  ;;  %s514_s2 = smov [#allocation8]  }
  0x38   :  { %v72_v2 = vld [vmem:[#allocation5 + $0x10] sm:$0xff]  ;;  %v361_v3 = vpack.c.bf16 %v71_v1, %v70_v0  ;;  %v73_v4 = vld [vmem:[#allocation5 + $0x18] sm:$0xff]  ;;  %v74_v6 = vld [vmem:[#allocation5 + $0x20] sm:$0xff]  ;;  %s259_s22 = sshll.u32 %s514_s2, 4  ;;  %s260_s22 = int_to_ptr.vmem [resolvable:$true] %s259_s22 }
  0x39   :  { %v365_v5 = vpack.c.bf16 %v73_v4, %v72_v2  ;;  %v75_v7 = vld [vmem:[#allocation5 + $0x28] sm:$0xff]  ;;  %v54_v9 = vld [vmem:[#allocation2] sm:$0xff]  ;;  %v76_v11 = vld [vmem:[#allocation5 + $0x30] sm:$0xff]  ;;  %s481_s23 = scalar_lea.vmem %s260_s22, 2048  ;;  %p486_p11 = scmp.lt.s32.totalorder %s260_s22, %s260_s22 }
  0x3a   :  { %362 = vmatprep.subr.bf16.mxu0 %v361_v3  ;;  %393 = vmatprep.subr.bf16.mxu1 %v361_v3  ;;  %v369_v8 = vpack.c.bf16 %v75_v7, %v74_v6  ;;  %v62_v10 = vld [vmem:[#allocation2 + $0x40] sm:$0xff]  ;;  %v77_v12 = vld [vmem:[#allocation5 + $0x38] sm:$0xff]  ;;  %v79_v15 = vld [vmem:[#allocation5 + $0x48] sm:$0xff]  ;;  %p482_p10 = scmp.ne.s32.totalorder %s260_s22, %s481_s23  ;;  %p487_p12 = scmp.lt.s32.totalorder %s481_s23, %s481_s23 }
  0x3b   :  { %364 = vmatpush3.bf16.msra.mxu0 %v361_v3  ;;  %401 = vmatpush3.bf16.msra.mxu1 %v361_v3  ;;  %v373_v13 = vpack.c.bf16 %v77_v12, %v76_v11  ;;  %v78_v14 = vld [vmem:[#allocation5 + $0x40] sm:$0xff]  ;;  %v80_v17 = vld [vmem:[#allocation5 + $0x50] sm:$0xff]  ;;  %v81_v18 = vld [vmem:[#allocation5 + $0x58] sm:$0xff] }
  0x3c   :  { %366 = vmatprep.subr.bf16.mxu0 %v365_v5  ;;  %394 = vmatprep.subr.bf16.mxu1 %v365_v5  ;;  %v377_v16 = vpack.c.bf16 %v79_v15, %v78_v14  ;;  %v381_v19 = vpack.c.bf16 %v81_v18, %v80_v17  ;;  %v82_v20 = vld [vmem:[#allocation5 + $0x60] sm:$0xff]  ;;  %v83_v21 = vld [vmem:[#allocation5 + $0x68] sm:$0xff]  ;;  %v84_v23 = vld [vmem:[#allocation5 + $0x70] sm:$0xff]  ;;  %p488_p13 = por %p487_p12, %p486_p11 }
  0x3d   :  { %337 = vmatprep.mubr.f32.mxu0 %v54_v9  ;;  %349 = vmatprep.mubr.f32.mxu1 %v62_v10  ;;  %v385_v22 = vpack.c.bf16 %v83_v21, %v82_v20  ;;  %v85_v24 = vld [vmem:[#allocation5 + $0x78] sm:$0xff]  ;;  %v55_v26 = vld [vmem:[#allocation2 + $0x8] sm:$0xff]  ;;  %v56_v28 = vld [vmem:[#allocation2 + $0x10] sm:$0xff] }
  0x3e   :  { %v389_v25 = vpack.c.bf16 %v85_v24, %v84_v23  ;;  %v63_v27 = vld [vmem:[#allocation2 + $0x48] sm:$0xff]  ;;  %v64_v29 = vld [vmem:[#allocation2 + $0x50] sm:$0xff]  ;;  %v57_v30 = vld [vmem:[#allocation2 + $0x18] sm:$0xff]  ;;  %p489_p0 = pnand %p488_p13, %p482_p10 }
  0x3f   :  { %368 = vmatpush3.bf16.msra.mxu0 %v365_v5  ;;  %402 = vmatpush3.bf16.msra.mxu1 %v365_v5  ;;  %v65_v31 = vld [vmem:[#allocation2 + $0x58] sm:$0xff]  ;;  %v58_v32 = vld [vmem:[#allocation2 + $0x20] sm:$0xff]  ;;  %v59_v34 = vld [vmem:[#allocation2 + $0x28] sm:$0xff] }
  0x40   :  { %370 = vmatprep.subr.bf16.mxu0 %v369_v8  ;;  %395 = vmatprep.subr.bf16.mxu1 %v369_v8  ;;  %v66_v33 = vld [vmem:[#allocation2 + $0x60] sm:$0xff]  ;;  %v67_v35 = vld [vmem:[#allocation2 + $0x68] sm:$0xff]  ;;  %v60_v36 = vld [vmem:[#allocation2 + $0x30] sm:$0xff] }
  0x41   :  { %v68_v37 = vld [vmem:[#allocation2 + $0x70] sm:$0xff]  ;;  %v61_v38 = vld [vmem:[#allocation2 + $0x38] sm:$0xff]  ;;  %v272_v40 = vld [vmem:[#allocation7] ss:$0 sm:$0xff] }
  0x42   :  { %v69_v39 = vld [vmem:[#allocation2 + $0x78] sm:$0xff] }
  0x43   :  { %372 = vmatpush3.bf16.msra.mxu0 %v369_v8  ;;  %403 = vmatpush3.bf16.msra.mxu1 %v369_v8 }
  0x44   :  { %374 = vmatprep.subr.bf16.mxu0 %v373_v13  ;;  %396 = vmatprep.subr.bf16.mxu1 %v373_v13 }
  0x47   :  { %376 = vmatpush3.bf16.msra.mxu0 %v373_v13  ;;  %404 = vmatpush3.bf16.msra.mxu1 %v373_v13 }
  0x48   :  { %378 = vmatprep.subr.bf16.mxu0 %v377_v16  ;;  %397 = vmatprep.subr.bf16.mxu1 %v377_v16 }
  0x4b   :  { %380 = vmatpush3.bf16.msra.mxu0 %v377_v16  ;;  %405 = vmatpush3.bf16.msra.mxu1 %v377_v16 }
  0x4c   :  { %382 = vmatprep.subr.bf16.mxu0 %v381_v19  ;;  %398 = vmatprep.subr.bf16.mxu1 %v381_v19 }
  0x4f   :  { %384 = vmatpush3.bf16.msra.mxu0 %v381_v19  ;;  %406 = vmatpush3.bf16.msra.mxu1 %v381_v19 }
  0x50   :  { %386 = vmatprep.subr.bf16.mxu0 %v385_v22  ;;  %399 = vmatprep.subr.bf16.mxu1 %v385_v22 }
  0x53   :  { %388 = vmatpush3.bf16.msra.mxu0 %v385_v22  ;;  %407 = vmatpush3.bf16.msra.mxu1 %v385_v22 }
  0x54   :  { %390 = vmatprep.subr.bf16.mxu0 %v389_v25  ;;  %400 = vmatprep.subr.bf16.mxu1 %v389_v25 }
  0x57   :  { %392 = vmatpush3.bf16.msra.mxu0 %v389_v25  ;;  %408 = vmatpush3.bf16.msra.mxu1 %v389_v25 }
  0x5a   :  { %338 = vmatmul.mubr.f32.vlgmr.msra.gmra.mrb[0].mxu0 %v55_v26  ;;  %350 = vmatmul.mubr.f32.vlgmr.msra.gmra.mrb[0].mxu1 %v63_v27 }
  0x5b   :  { %340 = vmatprep.mubr.f32.mxu0 %v56_v28  ;;  %352 = vmatprep.mubr.f32.mxu1 %v64_v29 }
  0x5e   :  { %341 = vmatmul.mubr.f32.gmra.mrb[2].mxu0 %v57_v30  ;;  %353 = vmatmul.mubr.f32.gmra.mrb[2].mxu1 %v65_v31 }
  0x5f   :  { %343 = vmatprep.mubr.f32.mxu0 %v58_v32  ;;  %355 = vmatprep.mubr.f32.mxu1 %v66_v33 }
  0x62   :  { %344 = vmatmul.mubr.f32.gmra.mrb[4].mxu0 %v59_v34  ;;  %356 = vmatmul.mubr.f32.gmra.mrb[4].mxu1 %v67_v35 }
  0x63   :  { %346 = vmatprep.mubr.f32.mxu0 %v60_v36  ;;  %358 = vmatprep.mubr.f32.mxu1 %v68_v37 }
  0x66   :  { %347 = vmatmul.mubr.f32.gmra.mrb[6].mxu0 %v61_v38  ;;  %359 = vmatmul.mubr.f32.gmra.mrb[6].mxu1 %v69_v39 }
 0x12d   :  { %v339_v41 = vpop.f32.mrb[0].mxu0  ;;  %v351_v42 = vpop.f32.mrb[0].mxu1 }
 0x12e   :  { %v165_v43 = vadd.f32 %v339_v41, %v272_v40  ;;  %v205_v44 = vadd.f32 %v351_v42, %v272_v40  ;;  %v159_v45 = vpop.f32.mrb[1].mxu0  ;;  %v199_v46 = vpop.f32.mrb[1].mxu1 }
 0x12f   :  { %v160_v47 = vadd.f32 %v272_v40, %v159_v45  ;;  %v200_v48 = vadd.f32 %v272_v40, %v199_v46 }
 0x130   :  { %239 = vst [vmem:[#allocation8 + $0x8] sm:$0xff] %v165_v43  ;;  %247 = vst [vmem:[#allocation8 + $0x48] sm:$0xff] %v205_v44 }
 0x131   :  { %238 = vst [vmem:[#allocation8] sm:$0xff] %v160_v47  ;;  %246 = vst [vmem:[#allocation8 + $0x40] sm:$0xff] %v200_v48  ;;  %v342_v49 = vpop.f32.mrb[2].mxu0  ;;  %v354_v50 = vpop.f32.mrb[2].mxu1 }
 0x132   :  { %v175_v51 = vadd.f32 %v342_v49, %v272_v40  ;;  %v215_v52 = vadd.f32 %v354_v50, %v272_v40  ;;  %v169_v53 = vpop.f32.mrb[3].mxu0  ;;  %v209_v54 = vpop.f32.mrb[3].mxu1 }
 0x133   :  { %v170_v55 = vadd.f32 %v272_v40, %v169_v53  ;;  %v210_v56 = vadd.f32 %v272_v40, %v209_v54 }
 0x134   :  { %241 = vst [vmem:[#allocation8 + $0x18] sm:$0xff] %v175_v51  ;;  %249 = vst [vmem:[#allocation8 + $0x58] sm:$0xff] %v215_v52 }
 0x135   :  { %240 = vst [vmem:[#allocation8 + $0x10] sm:$0xff] %v170_v55  ;;  %248 = vst [vmem:[#allocation8 + $0x50] sm:$0xff] %v210_v56  ;;  %v345_v57 = vpop.f32.mrb[4].mxu0  ;;  %v357_v58 = vpop.f32.mrb[4].mxu1 }
 0x136   :  { %v185_v59 = vadd.f32 %v345_v57, %v272_v40  ;;  %v225_v60 = vadd.f32 %v357_v58, %v272_v40  ;;  %v179_v61 = vpop.f32.mrb[5].mxu0  ;;  %v219_v62 = vpop.f32.mrb[5].mxu1 }
 0x137   :  { %v180_v63 = vadd.f32 %v272_v40, %v179_v61  ;;  %v220_v0 = vadd.f32 %v272_v40, %v219_v62 }
 0x138   :  { %243 = vst [vmem:[#allocation8 + $0x28] sm:$0xff] %v185_v59  ;;  %251 = vst [vmem:[#allocation8 + $0x68] sm:$0xff] %v225_v60 }
 0x139   :  { %242 = vst [vmem:[#allocation8 + $0x20] sm:$0xff] %v180_v63  ;;  %250 = vst [vmem:[#allocation8 + $0x60] sm:$0xff] %v220_v0  ;;  %v348_v1 = vpop.f32.mrb[6].mxu0  ;;  %v360_v2 = vpop.f32.mrb[6].mxu1 }
 0x13a   :  { %v195_v3 = vadd.f32 %v348_v1, %v272_v40  ;;  %v235_v4 = vadd.f32 %v360_v2, %v272_v40  ;;  %v189_v5 = vpop.f32.mrb[7].mxu0  ;;  %v229_v6 = vpop.f32.mrb[7].mxu1 }
 0x13b   :  { %v190_v7 = vadd.f32 %v272_v40, %v189_v5  ;;  %v230_v8 = vadd.f32 %v272_v40, %v229_v6 }
 0x13c   :  { %245 = vst [vmem:[#allocation8 + $0x38] sm:$0xff] %v195_v3  ;;  %253 = vst [vmem:[#allocation8 + $0x78] sm:$0xff] %v235_v4 }
 0x13d   :  { %244 = vst [vmem:[#allocation8 + $0x30] sm:$0xff] %v190_v7  ;;  %252 = vst [vmem:[#allocation8 + $0x70] sm:$0xff] %v230_v8 }
 0x13e   :  { %492 = shalt.err (!%p489_p0)
}
 0x13f   :  { %s493_s28 = scalar_lea.hbm %s602_s3, 2048 }
 0x140   :  { %p494_p1 = scmp.ne.s32.totalorder %s602_s3, %s493_s28  ;;  %p497_p2 = scmp.lt.u32.totalorder %s493_s28, %s602_s3 }
 0x142   :  { %p499_p3 = pnand %p497_p2, %p494_p1 }
 0x144   :  { %502 = shalt.err (!%p499_p3)
}
 0x145   :  { %265 = dma.vmem_to_hbm [thread:$0]  %s260_s22, 2048, %s602_s3, [#allocation4], %s511_s24, %s511_s24, %s512_s25  }
 0x146   :  { %507 = dma.done.wait [#allocation4], 2048  }
 0x147   :  { %508 = vsyncadd [#allocation4], 4294965248 }
 0x148   :  { %269 = vsyncpa [#allocation3], 1 }
 0x149   :  { %270 = vsyncpa [#allocation6], 1 }
 0x14a   :  { %271 = vsyncpa [#allocation4], 1 }

// kernel: decoder_rnn_forward.4
= control target key start
LH: loop header
LB: loop body
LE: loop exit
PB: predicated region body
PF: predicated region fallthrough
CT: control target
= control target key end

     0   :  { %7 = vsyncpa [#allocation3], 0  ;;  %s626_s0 = inlined_call_operand.hbm [shape: f32[8,8,512], index: 0, kind: input, shape index: {}]   ;;  %s627_s1 = inlined_call_operand.hbm [shape: f32[128,512], index: 1, kind: input, shape index: {}]   ;;  %s628_s2 = inlined_call_operand.hbm [shape: f32[8,8,128], index: 2, kind: output, shape index: {}]  }
   0x1   :  { %8 = vsyncpa [#allocation6], 0 }
   0x2   :  { %9 = vsyncpa [#allocation4], 0  ;;  %s540_s9 = smov [#allocation2]   ;;  %s444_s13 = scalar_lea.hbm %s626_s0, 4096 }
   0x3   :  { %s15_s10 = sshll.u32 %s540_s9, 4  ;;  %p445_p0 = scmp.ne.s32.totalorder %s626_s0, %s444_s13  ;;  %s16_s10 = int_to_ptr.vmem [resolvable:$true] %s15_s10 }
   0x4   :  { %p448_p1 = scmp.lt.u32.totalorder %s444_s13, %s626_s0 }
   0x6   :  { %p450_p2 = pnand %p448_p1, %p445_p0 }
   0x8   :  { %453 = shalt.err (!%p450_p2)
}
   0x9   :  { %s454_s18 = scalar_lea.vmem %s16_s10, 4096  ;;  %p459_p4 = scmp.lt.s32.totalorder %s16_s10, %s16_s10 }
   0xa   :  { %p455_p3 = scmp.ne.s32.totalorder %s16_s10, %s454_s18  ;;  %p460_p5 = scmp.lt.s32.totalorder %s454_s18, %s454_s18 }
   0xc   :  { %p461_p6 = por %p460_p5, %p459_p4 }
   0xe   :  { %p462_p7 = pnand %p461_p6, %p455_p3 }
  0x10   :  { %465 = shalt.err (!%p462_p7)
}
  0x11   :  { %s541_s19 = smov 512   ;;  %s542_s20 = smov 32  }
  0x12   :  { %21 = dma.hbm_to_vmem [thread:$0]  %s626_s0, 4096, %s16_s10, [#allocation3], %s541_s19, %s541_s19, %s542_s20  }
  0x13   :  { %s543_s23 = smov [#allocation5]   ;;  %s466_s27 = scalar_lea.hbm %s627_s1, 8192 }
  0x14   :  { %s27_s24 = sshll.u32 %s543_s23, 4  ;;  %p467_p8 = scmp.ne.s32.totalorder %s627_s1, %s466_s27  ;;  %s28_s24 = int_to_ptr.vmem [resolvable:$true] %s27_s24 }
  0x15   :  { %p470_p9 = scmp.lt.u32.totalorder %s466_s27, %s627_s1 }
  0x17   :  { %p472_p10 = pnand %p470_p9, %p467_p8 }
  0x19   :  { %475 = shalt.err (!%p472_p10)
}
  0x1a   :  { %s476_s4 = scalar_lea.vmem %s28_s24, 8192  ;;  %p481_p12 = scmp.lt.s32.totalorder %s28_s24, %s28_s24 }
  0x1b   :  { %p477_p11 = scmp.ne.s32.totalorder %s28_s24, %s476_s4  ;;  %p482_p13 = scmp.lt.s32.totalorder %s476_s4, %s476_s4 }
  0x1d   :  { %p483_p0 = por %p482_p13, %p481_p12 }
  0x1f   :  { %p484_p1 = pnand %p483_p0, %p477_p11 }
  0x21   :  { %487 = shalt.err (!%p484_p1)
}
  0x22   :  { %33 = dma.hbm_to_vmem [thread:$0]  %s627_s1, 8192, %s28_s24, [#allocation6], %s541_s19, %s541_s19, %s542_s20  }
  0x23   :  { %522 = dma.done.wait [#allocation3], 4096  }
  0x24   :  { %523 = vsyncadd [#allocation3], 4294963200 }
  0x25   :  { %524 = dma.done.wait [#allocation6], 8192  }
  0x26   :  { %525 = vsyncadd [#allocation6], 4294959104  ;;  %v587_v0 = vmov 0.0   ;;  %v589_v1 = vmov 0.0   ;;  %s591_s6 = smov 0  }
  0x27 LB: > { %v56_v2 = vld [vmem:[#allocation5 + $0x8] sm:$0xff]  ;;  %v55_v4 = vld [vmem:[#allocation5] sm:$0xff]  ;;  %v544_v9 = vmov 0.0   ;;  %v58_v21 = vld [vmem:[#allocation5 + $0x18] sm:$0xff]  ;;  %s331_s1 = sshll.u32 %s538_s6, 5  ;;  %s330_s8 = sshll.u32 %s538_s6, 3  ;;  %s538_s6 = sphi %s591_s6, %s45_s6   ;;  %v534_v1 = vphi %v589_v1, %v288_v1   ;;  %v530_v0 = vphi %v587_v0, %v286_v0  }
  0x28   : > { %v60_v3 = vld [vmem:[#allocation5 + $0x28] sm:$0xff]  ;;  %v59_v6 = vld [vmem:[#allocation5 + $0x20] sm:$0xff]  ;;  %183 = vmatprep.mubr.f32.mxu0 %v544_v9  ;;  %254 = vmatprep.mubr.f32.mxu1 %v544_v9  ;;  %v62_v22 = vld [vmem:[#allocation5 + $0x38] sm:$0xff]  ;;  %s50_s7 = scalar_lea.vmem [#allocation2], %s331_s1  ;;  %s290_s9 = scalar_lea.vmem [#allocation7], %s330_s8 }
  0x29   : > { %v332_v5 = vpack.c.bf16 %v60_v3, %v56_v2  ;;  %v64_v7 = vld [vmem:[#allocation5 + $0x48] sm:$0xff]  ;;  %v334_v10 = vpack.c.bf16 %v59_v6, %v55_v4  ;;  %v63_v12 = vld [vmem:[#allocation5 + $0x40] sm:$0xff]  ;;  %v364_v24 = vpack.c.bf16 %v62_v22, %v58_v21  ;;  %v57_v25 = vld [vmem:[#allocation5 + $0x10] sm:$0xff]  ;;  %s45_s6 = sadd.s32 1, %s538_s6  }
  0x2a   : > { %v68_v8 = vld [vmem:[#allocation5 + $0x68] sm:$0xff]  ;;  %v67_v13 = vld [vmem:[#allocation5 + $0x60] sm:$0xff]  ;;  %v61_v26 = vld [vmem:[#allocation5 + $0x30] sm:$0xff]  ;;  %p42_p2 = scmp.ge.s32.totalorder %s45_s6, 8  }
  0x2b   : > { %v336_v11 = vpack.c.bf16 %v68_v8, %v64_v7  ;;  %v72_v14 = vld [vmem:[#allocation5 + $0x88] sm:$0xff]  ;;  %333 = vmatprep.subr.bf16.mxu0 %v332_v5  ;;  %v338_v16 = vpack.c.bf16 %v67_v13, %v63_v12  ;;  %v71_v17 = vld [vmem:[#allocation5 + $0x80] sm:$0xff]  ;;  %v366_v27 = vpack.c.bf16 %v61_v26, %v57_v25  ;;  %365 = vmatprep.subr.bf16.mxu1 %v364_v24  ;;  %v66_v29 = vld [vmem:[#allocation5 + $0x58] sm:$0xff]  ;;  %s545_s10 = smov (%p42_p2), [#allocation7]  }
  0x2c   : > { %v76_v15 = vld [vmem:[#allocation5 + $0xa8] sm:$0xff]  ;;  %335 = vmatpush1.bf16.msra.mxu0 %v334_v10  ;;  %v75_v18 = vld [vmem:[#allocation5 + $0xa0] sm:$0xff]  ;;  %v70_v30 = vld [vmem:[#allocation5 + $0x78] sm:$0xff]  ;;  %s297_s11 = sshll.u32 (%p42_p2), %s545_s10, 4  ;;  %s298_s11 = int_to_ptr.vmem [resolvable:$true] %s297_s11 }
  0x2d   : > { %337 = vmatprep.subr.bf16.mxu0 %v336_v11  ;;  %v340_v19 = vpack.c.bf16 %v76_v15, %v72_v14  ;;  %v80_v20 = vld [vmem:[#allocation5 + $0xc8] sm:$0xff]  ;;  %v342_v28 = vpack.c.bf16 %v75_v18, %v71_v17  ;;  %v65_v31 = vld [vmem:[#allocation5 + $0x50] sm:$0xff]  ;;  %v79_v33 = vld [vmem:[#allocation5 + $0xc0] sm:$0xff]  ;;  %367 = vmatpush1.bf16.msra.mxu1 %v366_v27  ;;  %v368_v35 = vpack.c.bf16 %v70_v30, %v66_v29  ;;  %s488_s12 = scalar_lea.vmem (%p42_p2), %s298_s11, 1024  ;;  %p493_p4 = scmp.lt.s32.totalorder (%p42_p2), %s298_s11, %s298_s11 }
  0x2e   : > { %v84_v23 = vld [vmem:[#allocation5 + $0xe8] sm:$0xff]  ;;  %v83_v34 = vld [vmem:[#allocation5 + $0xe0] sm:$0xff]  ;;  %v69_v36 = vld [vmem:[#allocation5 + $0x70] sm:$0xff]  ;;  %p489_p3 = scmp.ne.s32.totalorder (%p42_p2), %s298_s11, %s488_s12  ;;  %p494_p5 = scmp.lt.s32.totalorder (%p42_p2), %s488_s12, %s488_s12 }
  0x2f   : > { %v344_v32 = vpack.c.bf16 %v84_v23, %v80_v20  ;;  %v88_v37 = vld [vmem:[#allocation5 + $0x108] sm:$0xff]  ;;  %v370_v39 = vpack.c.bf16 %v69_v36, %v65_v31  ;;  %v74_v40 = vld [vmem:[#allocation5 + $0x98] sm:$0xff]  ;;  %369 = vmatprep.subr.bf16.mxu1 %v368_v35  ;;  %v73_v42 = vld [vmem:[#allocation5 + $0x90] sm:$0xff]  ;;  %v346_v44 = vpack.c.bf16 %v83_v34, %v79_v33 }
  0x30   : > { %339 = vmatpush1.bf16.msra.mxu0 %v338_v16  ;;  %v92_v38 = vld [vmem:[#allocation5 + $0x128] sm:$0xff]  ;;  %v78_v41 = vld [vmem:[#allocation5 + $0xb8] sm:$0xff]  ;;  %v77_v43 = vld [vmem:[#allocation5 + $0xb0] sm:$0xff]  ;;  %p495_p6 = por (%p42_p2), %p494_p5, %p493_p4 }
  0x31   : > { %341 = vmatprep.subr.bf16.mxu0 %v340_v19  ;;  %v87_v45 = vld [vmem:[#allocation5 + $0x100] sm:$0xff]  ;;  %v372_v47 = vpack.c.bf16 %v78_v41, %v74_v40  ;;  %v348_v48 = vpack.c.bf16 %v92_v38, %v88_v37  ;;  %371 = vmatpush1.bf16.msra.mxu1 %v370_v39  ;;  %v96_v49 = vld [vmem:[#allocation5 + $0x148] sm:$0xff]  ;;  %v374_v50 = vpack.c.bf16 %v77_v43, %v73_v42  ;;  %v82_v51 = vld [vmem:[#allocation5 + $0xd8] sm:$0xff] }
  0x32   : > { %v91_v46 = vld [vmem:[#allocation5 + $0x120] sm:$0xff]  ;;  %v86_v52 = vld [vmem:[#allocation5 + $0xf8] sm:$0xff]  ;;  %v100_v53 = vld [vmem:[#allocation5 + $0x168] sm:$0xff]  ;;  %p496_p7 = pnand (%p42_p2), %p495_p6, %p489_p3 }
  0x33   : > { %373 = vmatprep.subr.bf16.mxu1 %v372_v47  ;;  %v376_v54 = vpack.c.bf16 %v86_v52, %v82_v51  ;;  %v81_v55 = vld [vmem:[#allocation5 + $0xd0] sm:$0xff]  ;;  %v350_v57 = vpack.c.bf16 %v91_v46, %v87_v45  ;;  %v90_v58 = vld [vmem:[#allocation5 + $0x118] sm:$0xff]  ;;  %v352_v60 = vpack.c.bf16 %v100_v53, %v96_v49  ;;  %v95_v61 = vld [vmem:[#allocation5 + $0x140] sm:$0xff] }
  0x34   : > { %343 = vmatpush1.bf16.msra.mxu0 %v342_v28  ;;  %v85_v56 = vld [vmem:[#allocation5 + $0xf0] sm:$0xff]  ;;  %v94_v59 = vld [vmem:[#allocation5 + $0x138] sm:$0xff]  ;;  %v99_v62 = vld [vmem:[#allocation5 + $0x160] sm:$0xff] }
  0x35   : > { %345 = vmatprep.subr.bf16.mxu0 %v344_v32  ;;  %375 = vmatpush1.bf16.msra.mxu1 %v374_v50  ;;  %v104_v63 = vld [vmem:[#allocation5 + $0x188] sm:$0xff]  ;;  %v378_v2 = vpack.c.bf16 %v85_v56, %v81_v55  ;;  %v380_v4 = vpack.c.bf16 %v94_v59, %v90_v58  ;;  %v89_v5 = vld [vmem:[#allocation5 + $0x110] sm:$0xff]  ;;  %v98_v7 = vld [vmem:[#allocation5 + $0x158] sm:$0xff]  ;;  %v354_v9 = vpack.c.bf16 %v99_v62, %v95_v61 }
  0x36   : > { %v108_v3 = vld [vmem:[#allocation5 + $0x1a8] sm:$0xff]  ;;  %377 = vmatprep.subr.bf16.mxu1 %v376_v54  ;;  %v93_v6 = vld [vmem:[#allocation5 + $0x130] sm:$0xff]  ;;  %v102_v8 = vld [vmem:[#allocation5 + $0x178] sm:$0xff] }
  0x37   : > { %v356_v10 = vpack.c.bf16 %v108_v3, %v104_v63  ;;  %v103_v11 = vld [vmem:[#allocation5 + $0x180] sm:$0xff]  ;;  %v112_v13 = vld [vmem:[#allocation5 + $0x1c8] sm:$0xff]  ;;  %v382_v14 = vpack.c.bf16 %v93_v6, %v89_v5  ;;  %v384_v16 = vpack.c.bf16 %v102_v8, %v98_v7  ;;  %v97_v17 = vld [vmem:[#allocation5 + $0x150] sm:$0xff] }
  0x38   : > { %347 = vmatpush1.bf16.msra.mxu0 %v346_v44  ;;  %v107_v12 = vld [vmem:[#allocation5 + $0x1a0] sm:$0xff]  ;;  %v116_v15 = vld [vmem:[#allocation5 + $0x1e8] sm:$0xff]  ;;  %v101_v18 = vld [vmem:[#allocation5 + $0x170] sm:$0xff] }
  0x39   : > { %349 = vmatprep.subr.bf16.mxu0 %v348_v48  ;;  %379 = vmatpush1.bf16.msra.mxu1 %v378_v2  ;;  %v106_v19 = vld [vmem:[#allocation5 + $0x198] sm:$0xff]  ;;  %v358_v21 = vpack.c.bf16 %v107_v12, %v103_v11  ;;  %v360_v22 = vpack.c.bf16 %v116_v15, %v112_v13  ;;  %v111_v23 = vld [vmem:[#allocation5 + $0x1c0] sm:$0xff]  ;;  %v386_v25 = vpack.c.bf16 %v101_v18, %v97_v17  ;;  %v105_v27 = vld [vmem:[#allocation5 + $0x190] sm:$0xff] }
  0x3a   : > { %381 = vmatprep.subr.bf16.mxu1 %v380_v4  ;;  %v110_v20 = vld [vmem:[#allocation5 + $0x1b8] sm:$0xff]  ;;  %v115_v24 = vld [vmem:[#allocation5 + $0x1e0] sm:$0xff]  ;;  %v109_v28 = vld [vmem:[#allocation5 + $0x1b0] sm:$0xff] }
  0x3b   : > { %v388_v26 = vpack.c.bf16 %v110_v20, %v106_v19  ;;  %v114_v29 = vld [vmem:[#allocation5 + $0x1d8] sm:$0xff]  ;;  %v362_v31 = vpack.c.bf16 %v115_v24, %v111_v23  ;;  %v390_v32 = vpack.c.bf16 %v109_v28, %v105_v27  ;;  %v113_v34 = vld [vmem:[#allocation5 + $0x1d0] sm:$0xff]  ;;  %v51_v37 = vld [vmem:[%s50_s7] sm:$0xff] }
  0x3c   : > { %351 = vmatpush1.bf16.msra.mxu0 %v350_v57  ;;  %v118_v30 = vld [vmem:[#allocation5 + $0x1f8] sm:$0xff]  ;;  %v117_v35 = vld [vmem:[#allocation5 + $0x1f0] sm:$0xff]  ;;  %v52_v38 = vld [vmem:[%s50_s7 + $0x8] sm:$0xff] }
  0x3d   : > { %353 = vmatprep.subr.bf16.mxu0 %v352_v60  ;;  %383 = vmatpush1.bf16.msra.mxu1 %v382_v14  ;;  %v392_v33 = vpack.c.bf16 %v118_v30, %v114_v29  ;;  %v394_v36 = vpack.c.bf16 %v117_v35, %v113_v34  ;;  %v54_v45 = vld [vmem:[%s50_s7 + $0x18] sm:$0xff]  ;;  %v53_v49 = vld [vmem:[%s50_s7 + $0x10] sm:$0xff] }
  0x3e   : > { %385 = vmatprep.subr.bf16.mxu1 %v384_v16 }
  0x40   : > { %355 = vmatpush1.bf16.msra.mxu0 %v354_v9 }
  0x41   : > { %357 = vmatprep.subr.bf16.mxu0 %v356_v10  ;;  %387 = vmatpush1.bf16.msra.mxu1 %v386_v25 }
  0x42   : > { %389 = vmatprep.subr.bf16.mxu1 %v388_v26 }
  0x44   : > { %359 = vmatpush1.bf16.msra.mxu0 %v358_v21 }
  0x45   : > { %361 = vmatprep.subr.bf16.mxu0 %v360_v22  ;;  %391 = vmatpush1.bf16.msra.mxu1 %v390_v32 }
  0x46   : > { %393 = vmatprep.subr.bf16.mxu1 %v392_v33 }
  0x48   : > { %363 = vmatpush1.bf16.msra.mxu0 %v362_v31 }
  0x49   : > { %395 = vmatpush1.bf16.msra.mxu1 %v394_v36 }
  0x4b   : > { %184 = vmatmul.mubr.f32.vlgmr.msra.gmra.mrb[0].mxu0 %v534_v1 }
  0x4c   : > { %255 = vmatmul.mubr.f32.vlgmr.msra.gmra.mrb[0].mxu1 %v534_v1 }
 0x11e   : > { %v185_v39 = vpop.f32.mrb[0].mxu0 }
 0x11f   : > { %v261_v40 = vadd.f32 %v185_v39, %v51_v37  ;;  %v187_v41 = vpop.f32.mrb[1].mxu0  ;;  %v256_v46 = vpop.f32.mrb[0].mxu1 }
 0x120   : > { %v262_v42 = vadd.f32 %v187_v41, %v52_v38  ;;  %v258_v47 = vpop.f32.mrb[1].mxu1  ;;  %v263_v51 = vadd.f32 %v256_v46, %v53_v49 }
 0x121   : > { %v327_v43 = vmul.f32 -1.442695, %v261_v40  ;;  %v264_v48 = vadd.f32 %v258_v47, %v54_v45 }
 0x122   : > { %v328_v44 = vmul.f32 -1.442695, %v262_v42 }
 0x123   : > { %428 = vpow2.f32 %v327_v43  ;;  %v329_v50 = vmul.f32 -1.442695, %v264_v48 }
 0x124   : > { %430 = vpow2.f32 %v328_v44 }
 0x125   : > { %432 = vpow2.f32 %v329_v50 }
 0x126   : > { %434 = vtanh.f32 %v263_v51 }
 0x12d   : > { %v429_v1 = vpop.eup %428 }
 0x12e   : > { %v431_v52 = vpop.eup %430  ;;  %v268_v53 = vadd.f32 1.0, %v429_v1 }
 0x12f   : > { %v274_v54 = vadd.f32 1.0, %v431_v52  ;;  %v433_v55 = vpop.eup %432 }
 0x130   : > { %436 = vrcp.f32 %v268_v53  ;;  %v435_v56 = vpop.eup %434  ;;  %v281_v58 = vadd.f32 1.0, %v433_v55 }
 0x131   : > { %438 = vrcp.f32 %v274_v54 }
 0x132   : > { %440 = vrcp.f32 %v281_v58 }
 0x13a   : > { %v437_v57 = vpop.eup %436 }
 0x13b   : > { %v439_v59 = vpop.eup %438  ;;  %v285_v60 = vmul.f32 %v437_v57, %v435_v56 }
 0x13c   : > { %v284_v61 = vmul.f32 %v530_v0, %v439_v59  ;;  %v441_v62 = vpop.eup %440 }
 0x13e   : > { %v286_v0 = vadd.f32 %v285_v60, %v284_v61  }
 0x140   : > { %442 = vtanh.f32 %v286_v0 }
 0x147   :  { %44 = sbr.rel (!%p42_p2) target bundleno = 39 (0x27), region = 45 }
 0x14a   : > { %v443_v63 = vpop.eup %442 }
 0x14b   : > { %v288_v1 = vmul.f32 %v443_v63, %v441_v62  }
 0x14d   : > { %291 = vst [vmem:[%s290_s9] sm:$0xff] %v288_v1 }
 0x14e   :  { %499 = shalt.err (!%p496_p7)
}
 0x14f   :  { %s500_s15 = scalar_lea.hbm %s628_s2, 1024 }
 0x150   :  { %p501_p8 = scmp.ne.s32.totalorder %s628_s2, %s500_s15  ;;  %p504_p9 = scmp.lt.u32.totalorder %s500_s15, %s628_s2 }
 0x152   :  { %p506_p10 = pnand %p504_p9, %p501_p8 }
 0x154   :  { %509 = shalt.err (!%p506_p10)
}
 0x155   :  { %s546_s20 = smov 128   ;;  %s547_s21 = smov 8  }
 0x156   :  { %303 = dma.vmem_to_hbm [thread:$0]  %s298_s11, 1024, %s628_s2, [#allocation4], %s546_s20, %s546_s20, %s547_s21  }
 0x157   :  { %526 = dma.done.wait [#allocation4], 1024  }
 0x158   :  { %527 = vsyncadd [#allocation4], 4294966272 }
 0x159   :  { %307 = vsyncpa [#allocation3], 1 }
 0x15a   :  { %308 = vsyncpa [#allocation6], 1 }
 0x15b   :  { %309 = vsyncpa [#allocation4], 1 }

// kernel: decoder_rnn_forward.3
= control target key start
LH: loop header
LB: loop body
LE: loop exit
PB: predicated region body
PF: predicated region fallthrough
CT: control target
= control target key end

     0   :  { %8 = vsyncpa [#allocation3], 0  ;;  %s931_s0 = inlined_call_operand.hbm [shape: f32[128,32], index: 0, kind: input, shape index: {}]   ;;  %s932_s1 = inlined_call_operand.hbm [shape: f32[32,512], index: 1, kind: input, shape index: {}]   ;;  %s933_s2 = inlined_call_operand.hbm [shape: f32[1,512], index: 2, kind: input, shape index: {}]   ;;  %s934_s3 = inlined_call_operand.hbm [shape: f32[128,512], index: 3, kind: output, shape index: {}]  }
   0x1   :  { %9 = vsyncpa [#allocation6], 0 }
   0x2   :  { %10 = vsyncpa [#allocation4], 0  ;;  %s712_s12 = smov [#allocation5]   ;;  %s618_s16 = scalar_lea.hbm %s932_s1, 2048 }
   0x3   :  { %s28_s13 = sshll.u32 %s712_s12, 4  ;;  %p619_p0 = scmp.ne.s32.totalorder %s932_s1, %s618_s16  ;;  %s29_s13 = int_to_ptr.vmem [resolvable:$true] %s28_s13 }
   0x4   :  { %p622_p1 = scmp.lt.u32.totalorder %s618_s16, %s932_s1 }
   0x6   :  { %p624_p2 = pnand %p622_p1, %p619_p0 }
   0x8   :  { %627 = shalt.err (!%p624_p2)
}
   0x9   :  { %s628_s21 = scalar_lea.vmem %s29_s13, 2048  ;;  %p633_p4 = scmp.lt.s32.totalorder %s29_s13, %s29_s13 }
   0xa   :  { %p629_p3 = scmp.ne.s32.totalorder %s29_s13, %s628_s21  ;;  %p634_p5 = scmp.lt.s32.totalorder %s628_s21, %s628_s21 }
   0xc   :  { %p635_p6 = por %p634_p5, %p633_p4 }
   0xe   :  { %p636_p7 = pnand %p635_p6, %p629_p3 }
  0x10   :  { %639 = shalt.err (!%p636_p7)
}
  0x11   :  { %s713_s22 = smov 512   ;;  %s714_s23 = smov 32  }
  0x12   :  { %34 = dma.hbm_to_vmem [thread:$0]  %s932_s1, 2048, %s29_s13, [#allocation6], %s713_s22, %s713_s22, %s714_s23  }
  0x13   :  { %s715_s26 = smov [#allocation2]   ;;  %s640_s30 = scalar_lea.hbm %s931_s0, 2048 }
  0x14   :  { %s16_s27 = sshll.u32 %s715_s26, 4  ;;  %p641_p8 = scmp.ne.s32.totalorder %s931_s0, %s640_s30  ;;  %s17_s27 = int_to_ptr.vmem [resolvable:$true] %s16_s27 }
  0x15   :  { %p644_p9 = scmp.lt.u32.totalorder %s640_s30, %s931_s0 }
  0x17   :  { %p646_p10 = pnand %p644_p9, %p641_p8 }
  0x19   :  { %649 = shalt.err (!%p646_p10)
}
  0x1a   :  { %s650_s8 = scalar_lea.vmem %s17_s27, 2048  ;;  %p655_p12 = scmp.lt.s32.totalorder %s17_s27, %s17_s27 }
  0x1b   :  { %p651_p11 = scmp.ne.s32.totalorder %s17_s27, %s650_s8  ;;  %p656_p13 = scmp.lt.s32.totalorder %s650_s8, %s650_s8 }
  0x1d   :  { %p657_p0 = por %p656_p13, %p655_p12 }
  0x1f   :  { %p658_p1 = pnand %p657_p0, %p651_p11 }
  0x21   :  { %661 = shalt.err (!%p658_p1)
}
  0x22   :  { %s716_s1 = smov 128   ;;  %s717_s9 = smov 8  }
  0x23   :  { %22 = dma.hbm_to_vmem [thread:$0]  %s931_s0, 2048, %s17_s27, [#allocation3], %s716_s1, %s716_s1, %s717_s9  }
  0x24   :  { %s718_s12 = smov [#allocation7]   ;;  %s662_s16 = scalar_lea.hbm %s933_s2, 64 }
  0x25   :  { %s41_s13 = sshll.u32 %s718_s12, 4  ;;  %p663_p2 = scmp.ne.s32.totalorder %s933_s2, %s662_s16  ;;  %s42_s13 = int_to_ptr.vmem [resolvable:$true] %s41_s13 }
  0x26   :  { %p666_p3 = scmp.lt.u32.totalorder %s662_s16, %s933_s2 }
  0x28   :  { %p668_p4 = pnand %p666_p3, %p663_p2 }
  0x2a   :  { %671 = shalt.err (!%p668_p4)
}
  0x2b   :  { %s672_s21 = scalar_lea.vmem %s42_s13, 64  ;;  %p677_p6 = scmp.lt.s32.totalorder %s42_s13, %s42_s13 }
  0x2c   :  { %p673_p5 = scmp.ne.s32.totalorder %s42_s13, %s672_s21  ;;  %p678_p7 = scmp.lt.s32.totalorder %s672_s21, %s672_s21 }
  0x2e   :  { %p679_p8 = por %p678_p7, %p677_p6 }
  0x30   :  { %p680_p9 = pnand %p679_p8, %p673_p5 }
  0x32   :  { %683 = shalt.err (!%p680_p9)
}
  0x33   :  { %44 = dma.hbm_to_vmem [thread:$0]  %s933_s2, 64, %s42_s13, [#allocation6]  }
  0x34   :  { %706 = dma.done.wait [#allocation3], 2048  }
  0x35   :  { %707 = vsyncadd [#allocation3], 4294965248 }
  0x36   :  { %708 = dma.done.wait [#allocation6], 2112  }
  0x37   :  { %709 = vsyncadd [#allocation6], 4294965184  ;;  %v719_v0 = vmov 0.0   ;;  %v71_v1 = vld [vmem:[#allocation5 + $0x8] sm:$0xff]  ;;  %v73_v3 = vld [vmem:[#allocation5 + $0x18] sm:$0xff]  ;;  %vm108_vm0 = vcmask 261120   ;;  %v88_v41 = vlaneseq }
  0x38   :  { %221 = vmatprep.mubr.f32.mxu0 %v719_v0  ;;  %382 = vmatprep.mubr.f32.mxu1 %v719_v0  ;;  %v75_v2 = vld [vmem:[#allocation5 + $0x28] sm:$0xff]  ;;  %v77_v5 = vld [vmem:[#allocation5 + $0x38] sm:$0xff]  ;;  %v70_v6 = vld [vmem:[#allocation5] sm:$0xff]  ;;  %s720_s2 = smov [#allocation8]  }
  0x39   :  { %v593_v4 = vpack.c.bf16 %v75_v2, %v71_v1  ;;  %v74_v7 = vld [vmem:[#allocation5 + $0x20] sm:$0xff]  ;;  %v601_v8 = vpack.c.bf16 %v77_v5, %v73_v3  ;;  %v72_v10 = vld [vmem:[#allocation5 + $0x10] sm:$0xff]  ;;  %v79_v12 = vld [vmem:[#allocation5 + $0x48] sm:$0xff]  ;;  %v89_v42 = vshrl.u32 %v88_v41, 7  ;;  %s548_s25 = sshll.u32 %s720_s2, 4  ;;  %s549_s25 = int_to_ptr.vmem [resolvable:$true] %s548_s25 }
  0x3a   :  { %v595_v9 = vpack.c.bf16 %v74_v7, %v70_v6  ;;  %v76_v11 = vld [vmem:[#allocation5 + $0x30] sm:$0xff]  ;;  %v83_v14 = vld [vmem:[#allocation5 + $0x68] sm:$0xff]  ;;  %v81_v15 = vld [vmem:[#allocation5 + $0x58] sm:$0xff]  ;;  %s684_s26 = scalar_lea.vmem %s549_s25, 8192  ;;  %p689_p11 = scmp.lt.s32.totalorder %s549_s25, %s549_s25 }
  0x3b   :  { %594 = vmatprep.subr.bf16.mxu0 %v593_v4  ;;  %v603_v13 = vpack.c.bf16 %v76_v11, %v72_v10  ;;  %v85_v16 = vld [vmem:[#allocation5 + $0x78] sm:$0xff]  ;;  %602 = vmatprep.subr.bf16.mxu1 %v601_v8  ;;  %v597_v17 = vpack.c.bf16 %v83_v14, %v79_v12  ;;  %v78_v19 = vld [vmem:[#allocation5 + $0x40] sm:$0xff]  ;;  %v80_v21 = vld [vmem:[#allocation5 + $0x50] sm:$0xff]  ;;  %v90_v43 = vsub.s32 0, %v89_v42  ;;  %v98_v45 = vsub.s32 2, %v89_v42  ;;  %p685_p10 = scmp.ne.s32.totalorder %s549_s25, %s684_s26  ;;  %p690_p12 = scmp.lt.s32.totalorder %s684_s26, %s684_s26 }
  0x3c   :  { %596 = vmatpush1.bf16.msra.mxu0 %v595_v9  ;;  %v605_v18 = vpack.c.bf16 %v85_v16, %v81_v15  ;;  %v82_v20 = vld [vmem:[#allocation5 + $0x60] sm:$0xff]  ;;  %v84_v23 = vld [vmem:[#allocation5 + $0x70] sm:$0xff]  ;;  %v55_v26 = vld [vmem:[#allocation2 + $0x8] sm:$0xff]  ;;  %v94_v46 = vsub.s32 1, %v89_v42  ;;  %v102_v47 = vsub.s32 3, %v89_v42 }
  0x3d   :  { %604 = vmatpush1.bf16.msra.mxu1 %v603_v13  ;;  %v599_v22 = vpack.c.bf16 %v82_v20, %v78_v19  ;;  %598 = vmatprep.subr.bf16.mxu0 %v597_v17  ;;  %v607_v24 = vpack.c.bf16 %v84_v23, %v80_v21  ;;  %v54_v25 = vld [vmem:[#allocation2] sm:$0xff]  ;;  %v56_v27 = vld [vmem:[#allocation2 + $0x10] sm:$0xff]  ;;  %v57_v28 = vld [vmem:[#allocation2 + $0x18] sm:$0xff]  ;;  %p691_p13 = por %p690_p12, %p689_p11 }
  0x3e   :  { %606 = vmatprep.subr.bf16.mxu1 %v605_v18  ;;  %v58_v29 = vld [vmem:[#allocation2 + $0x20] sm:$0xff]  ;;  %v59_v30 = vld [vmem:[#allocation2 + $0x28] sm:$0xff]  ;;  %v60_v31 = vld [vmem:[#allocation2 + $0x30] sm:$0xff] }
  0x3f   :  { %v61_v32 = vld [vmem:[#allocation2 + $0x38] sm:$0xff]  ;;  %v62_v33 = vld [vmem:[#allocation2 + $0x40] sm:$0xff]  ;;  %v63_v34 = vld [vmem:[#allocation2 + $0x48] sm:$0xff]  ;;  %p692_p0 = pnand %p691_p13, %p685_p10 }
  0x40   :  { %600 = vmatpush1.bf16.msra.mxu0 %v599_v22  ;;  %v64_v35 = vld [vmem:[#allocation2 + $0x50] sm:$0xff]  ;;  %v65_v36 = vld [vmem:[#allocation2 + $0x58] sm:$0xff]  ;;  %v66_v37 = vld [vmem:[#allocation2 + $0x60] sm:$0xff] }
  0x41   :  { %608 = vmatpush1.bf16.msra.mxu1 %v607_v24  ;;  %v67_v38 = vld [vmem:[#allocation2 + $0x68] sm:$0xff]  ;;  %v68_v39 = vld [vmem:[#allocation2 + $0x70] sm:$0xff]  ;;  %v69_v40 = vld [vmem:[#allocation2 + $0x78] sm:$0xff] }
  0x42   :  { %v86_v44 = vld [vmem:[#allocation7] sm:$0xf] }
  0x43   :  { %561 = vmatmul.mubr.msk.f32.vlgmr.msra.gmra.mrb[0].mxu0 %vm108_vm0, %v54_v25  ;;  %v844_v48 = vrot.slane %v86_v44, %v90_v43  ;;  %v846_v49 = vrot.slane %v86_v44, %v98_v45  ;;  %v848_v50 = vrot.slane %v86_v44, %v94_v46  ;;  %v850_v51 = vrot.slane %v86_v44, %v102_v47 }
  0x44   :  { %577 = vmatmul.mubr.msk.f32.vlgmr.msra.gmra.mrb[0].mxu1 %vm108_vm0, %v54_v25  ;;  %227 = vmatprep.mubr.f32.mxu0 %v719_v0 }
  0x45   :  { %388 = vmatprep.mubr.f32.mxu1 %v719_v0 }
  0x47   :  { %562 = vmatmul.mubr.msk.f32.gmra.mrb[2].mxu0 %vm108_vm0, %v55_v26 }
  0x48   :  { %578 = vmatmul.mubr.msk.f32.gmra.mrb[2].mxu1 %vm108_vm0, %v55_v26  ;;  %233 = vmatprep.mubr.f32.mxu0 %v719_v0 }
  0x49   :  { %394 = vmatprep.mubr.f32.mxu1 %v719_v0 }
  0x4b   :  { %563 = vmatmul.mubr.msk.f32.gmra.mrb[4].mxu0 %vm108_vm0, %v56_v27 }
  0x4c   :  { %579 = vmatmul.mubr.msk.f32.gmra.mrb[4].mxu1 %vm108_vm0, %v56_v27  ;;  %239 = vmatprep.mubr.f32.mxu0 %v719_v0 }
  0x4d   :  { %400 = vmatprep.mubr.f32.mxu1 %v719_v0 }
  0x4f   :  { %564 = vmatmul.mubr.msk.f32.gmra.mrb[6].mxu0 %vm108_vm0, %v57_v28 }
  0x50   :  { %580 = vmatmul.mubr.msk.f32.gmra.mrb[6].mxu1 %vm108_vm0, %v57_v28  ;;  %245 = vmatprep.mubr.f32.mxu0 %v719_v0 }
  0x51   :  { %406 = vmatprep.mubr.f32.mxu1 %v719_v0 }
  0x53   :  { %565 = vmatmul.mubr.msk.f32.gmra.mrb[8].mxu0 %vm108_vm0, %v58_v29 }
  0x54   :  { %581 = vmatmul.mubr.msk.f32.gmra.mrb[8].mxu1 %vm108_vm0, %v58_v29  ;;  %251 = vmatprep.mubr.f32.mxu0 %v719_v0 }
  0x55   :  { %412 = vmatprep.mubr.f32.mxu1 %v719_v0 }
  0x57   :  { %566 = vmatmul.mubr.msk.f32.gmra.mrb[10].mxu0 %vm108_vm0, %v59_v30 }
  0x58   :  { %582 = vmatmul.mubr.msk.f32.gmra.mrb[10].mxu1 %vm108_vm0, %v59_v30  ;;  %257 = vmatprep.mubr.f32.mxu0 %v719_v0 }
  0x59   :  { %418 = vmatprep.mubr.f32.mxu1 %v719_v0 }
  0x5b   :  { %567 = vmatmul.mubr.msk.f32.gmra.mrb[12].mxu0 %vm108_vm0, %v60_v31 }
  0x5c   :  { %583 = vmatmul.mubr.msk.f32.gmra.mrb[12].mxu1 %vm108_vm0, %v60_v31  ;;  %263 = vmatprep.mubr.f32.mxu0 %v719_v0 }
  0x5d   :  { %424 = vmatprep.mubr.f32.mxu1 %v719_v0 }
  0x5f   :  { %568 = vmatmul.mubr.msk.f32.gmra.mrb[14].mxu0 %vm108_vm0, %v61_v32 }
  0x60   :  { %584 = vmatmul.mubr.msk.f32.gmra.mrb[14].mxu1 %vm108_vm0, %v61_v32  ;;  %269 = vmatprep.mubr.f32.mxu0 %v719_v0 }
  0x61   :  { %430 = vmatprep.mubr.f32.mxu1 %v719_v0 }
  0x63   :  { %569 = vmatmul.mubr.msk.f32.gmra.mrb[16].mxu0 %vm108_vm0, %v62_v33 }
  0x64   :  { %585 = vmatmul.mubr.msk.f32.gmra.mrb[16].mxu1 %vm108_vm0, %v62_v33  ;;  %275 = vmatprep.mubr.f32.mxu0 %v719_v0 }
  0x65   :  { %436 = vmatprep.mubr.f32.mxu1 %v719_v0 }
  0x67   :  { %570 = vmatmul.mubr.msk.f32.gmra.mrb[18].mxu0 %vm108_vm0, %v63_v34 }
  0x68   :  { %586 = vmatmul.mubr.msk.f32.gmra.mrb[18].mxu1 %vm108_vm0, %v63_v34  ;;  %281 = vmatprep.mubr.f32.mxu0 %v719_v0 }
  0x69   :  { %442 = vmatprep.mubr.f32.mxu1 %v719_v0 }
  0x6b   :  { %571 = vmatmul.mubr.msk.f32.gmra.mrb[20].mxu0 %vm108_vm0, %v64_v35 }
  0x6c   :  { %587 = vmatmul.mubr.msk.f32.gmra.mrb[20].mxu1 %vm108_vm0, %v64_v35  ;;  %287 = vmatprep.mubr.f32.mxu0 %v719_v0 }
  0x6d   :  { %448 = vmatprep.mubr.f32.mxu1 %v719_v0 }
  0x6f   :  { %572 = vmatmul.mubr.msk.f32.gmra.mrb[22].mxu0 %vm108_vm0, %v65_v36 }
  0x70   :  { %588 = vmatmul.mubr.msk.f32.gmra.mrb[22].mxu1 %vm108_vm0, %v65_v36  ;;  %293 = vmatprep.mubr.f32.mxu0 %v719_v0 }
  0x71   :  { %454 = vmatprep.mubr.f32.mxu1 %v719_v0 }
  0x73   :  { %573 = vmatmul.mubr.msk.f32.gmra.mrb[24].mxu0 %vm108_vm0, %v66_v37 }
  0x74   :  { %589 = vmatmul.mubr.msk.f32.gmra.mrb[24].mxu1 %vm108_vm0, %v66_v37  ;;  %299 = vmatprep.mubr.f32.mxu0 %v719_v0 }
  0x75   :  { %460 = vmatprep.mubr.f32.mxu1 %v719_v0 }
  0x77   :  { %574 = vmatmul.mubr.msk.f32.gmra.mrb[26].mxu0 %vm108_vm0, %v67_v38 }
  0x78   :  { %590 = vmatmul.mubr.msk.f32.gmra.mrb[26].mxu1 %vm108_vm0, %v67_v38  ;;  %305 = vmatprep.mubr.f32.mxu0 %v719_v0 }
  0x79   :  { %466 = vmatprep.mubr.f32.mxu1 %v719_v0 }
  0x7b   :  { %575 = vmatmul.mubr.msk.f32.gmra.mrb[28].mxu0 %vm108_vm0, %v68_v39 }
  0x7c   :  { %591 = vmatmul.mubr.msk.f32.gmra.mrb[28].mxu1 %vm108_vm0, %v68_v39  ;;  %311 = vmatprep.mubr.f32.mxu0 %v719_v0 }
  0x7d   :  { %472 = vmatprep.mubr.f32.mxu1 %v719_v0 }
  0x7f   :  { %576 = vmatmul.mubr.msk.f32.gmra.mrb[30].mxu0 %vm108_vm0, %v69_v40 }
  0x80   :  { %592 = vmatmul.mubr.msk.f32.gmra.mrb[30].mxu1 %vm108_vm0, %v69_v40 }
 0x116   :  { %v223_v52 = vpop.f32.mrb[0].mxu0 }
 0x117   :  { %v224_v53 = vadd.f32 %v223_v52, %v844_v48  ;;  %v384_v54 = vpop.f32.mrb[0].mxu1  ;;  %v225_v55 = vpop.f32.mrb[1].mxu0 }
 0x118   :  { %v385_v56 = vadd.f32 %v384_v54, %v846_v49  ;;  %v226_v57 = vadd.f32 %v225_v55, %v848_v50  ;;  %v386_v58 = vpop.f32.mrb[1].mxu1 }
 0x119   :  { %479 = vst [vmem:[#allocation8] sm:$0xff] %v224_v53  ;;  %v387_v59 = vadd.f32 %v386_v58, %v850_v51 }
 0x11a   :  { %481 = vst [vmem:[#allocation8 + $0x10] sm:$0xff] %v385_v56  ;;  %480 = vst [vmem:[#allocation8 + $0x8] sm:$0xff] %v226_v57  ;;  %v229_v60 = vpop.f32.mrb[2].mxu0 }
 0x11b   :  { %482 = vst [vmem:[#allocation8 + $0x18] sm:$0xff] %v387_v59  ;;  %v230_v61 = vadd.f32 %v229_v60, %v844_v48  ;;  %v390_v62 = vpop.f32.mrb[2].mxu1  ;;  %v231_v63 = vpop.f32.mrb[3].mxu0 }
 0x11c   :  { %v391_v0 = vadd.f32 %v390_v62, %v846_v49  ;;  %v232_v1 = vadd.f32 %v231_v63, %v848_v50  ;;  %v392_v2 = vpop.f32.mrb[3].mxu1 }
 0x11d   :  { %483 = vst [vmem:[#allocation8 + $0x20] sm:$0xff] %v230_v61  ;;  %v393_v3 = vadd.f32 %v392_v2, %v850_v51 }
 0x11e   :  { %485 = vst [vmem:[#allocation8 + $0x30] sm:$0xff] %v391_v0  ;;  %484 = vst [vmem:[#allocation8 + $0x28] sm:$0xff] %v232_v1  ;;  %v235_v4 = vpop.f32.mrb[4].mxu0 }
 0x11f   :  { %486 = vst [vmem:[#allocation8 + $0x38] sm:$0xff] %v393_v3  ;;  %v236_v5 = vadd.f32 %v235_v4, %v844_v48  ;;  %v396_v6 = vpop.f32.mrb[4].mxu1  ;;  %v237_v7 = vpop.f32.mrb[5].mxu0 }
 0x120   :  { %v397_v8 = vadd.f32 %v396_v6, %v846_v49  ;;  %v238_v9 = vadd.f32 %v237_v7, %v848_v50  ;;  %v398_v10 = vpop.f32.mrb[5].mxu1 }
 0x121   :  { %487 = vst [vmem:[#allocation8 + $0x40] sm:$0xff] %v236_v5  ;;  %v399_v11 = vadd.f32 %v398_v10, %v850_v51 }
 0x122   :  { %489 = vst [vmem:[#allocation8 + $0x50] sm:$0xff] %v397_v8  ;;  %488 = vst [vmem:[#allocation8 + $0x48] sm:$0xff] %v238_v9  ;;  %v241_v12 = vpop.f32.mrb[6].mxu0 }
 0x123   :  { %490 = vst [vmem:[#allocation8 + $0x58] sm:$0xff] %v399_v11  ;;  %v242_v13 = vadd.f32 %v241_v12, %v844_v48  ;;  %v402_v14 = vpop.f32.mrb[6].mxu1  ;;  %v243_v15 = vpop.f32.mrb[7].mxu0 }
 0x124   :  { %v403_v16 = vadd.f32 %v402_v14, %v846_v49  ;;  %v244_v17 = vadd.f32 %v243_v15, %v848_v50  ;;  %v404_v18 = vpop.f32.mrb[7].mxu1 }
 0x125   :  { %491 = vst [vmem:[#allocation8 + $0x60] sm:$0xff] %v242_v13  ;;  %v405_v19 = vadd.f32 %v404_v18, %v850_v51 }
 0x126   :  { %493 = vst [vmem:[#allocation8 + $0x70] sm:$0xff] %v403_v16  ;;  %492 = vst [vmem:[#allocation8 + $0x68] sm:$0xff] %v244_v17  ;;  %v247_v20 = vpop.f32.mrb[8].mxu0 }
 0x127   :  { %494 = vst [vmem:[#allocation8 + $0x78] sm:$0xff] %v405_v19  ;;  %v248_v21 = vadd.f32 %v247_v20, %v844_v48  ;;  %v408_v22 = vpop.f32.mrb[8].mxu1  ;;  %v249_v23 = vpop.f32.mrb[9].mxu0 }
 0x128   :  { %v409_v24 = vadd.f32 %v408_v22, %v846_v49  ;;  %v250_v25 = vadd.f32 %v249_v23, %v848_v50  ;;  %v410_v26 = vpop.f32.mrb[9].mxu1 }
 0x129   :  { %495 = vst [vmem:[#allocation8 + $0x80] sm:$0xff] %v248_v21  ;;  %v411_v27 = vadd.f32 %v410_v26, %v850_v51 }
 0x12a   :  { %497 = vst [vmem:[#allocation8 + $0x90] sm:$0xff] %v409_v24  ;;  %496 = vst [vmem:[#allocation8 + $0x88] sm:$0xff] %v250_v25  ;;  %v253_v28 = vpop.f32.mrb[10].mxu0 }
 0x12b   :  { %498 = vst [vmem:[#allocation8 + $0x98] sm:$0xff] %v411_v27  ;;  %v254_v29 = vadd.f32 %v253_v28, %v844_v48  ;;  %v414_v30 = vpop.f32.mrb[10].mxu1  ;;  %v255_v31 = vpop.f32.mrb[11].mxu0 }
 0x12c   :  { %v415_v32 = vadd.f32 %v414_v30, %v846_v49  ;;  %v256_v33 = vadd.f32 %v255_v31, %v848_v50  ;;  %v416_v34 = vpop.f32.mrb[11].mxu1 }
 0x12d   :  { %499 = vst [vmem:[#allocation8 + $0xa0] sm:$0xff] %v254_v29  ;;  %v417_v35 = vadd.f32 %v416_v34, %v850_v51 }
 0x12e   :  { %501 = vst [vmem:[#allocation8 + $0xb0] sm:$0xff] %v415_v32  ;;  %500 = vst [vmem:[#allocation8 + $0xa8] sm:$0xff] %v256_v33  ;;  %v259_v36 = vpop.f32.mrb[12].mxu0 }
 0x12f   :  { %502 = vst [vmem:[#allocation8 + $0xb8] sm:$0xff] %v417_v35  ;;  %v260_v37 = vadd.f32 %v259_v36, %v844_v48  ;;  %v420_v38 = vpop.f32.mrb[12].mxu1  ;;  %v261_v39 = vpop.f32.mrb[13].mxu0 }
 0x130   :  { %v421_v40 = vadd.f32 %v420_v38, %v846_v49  ;;  %v262_v41 = vadd.f32 %v261_v39, %v848_v50  ;;  %v422_v42 = vpop.f32.mrb[13].mxu1 }
 0x131   :  { %503 = vst [vmem:[#allocation8 + $0xc0] sm:$0xff] %v260_v37  ;;  %v423_v43 = vadd.f32 %v422_v42, %v850_v51 }
 0x132   :  { %505 = vst [vmem:[#allocation8 + $0xd0] sm:$0xff] %v421_v40  ;;  %504 = vst [vmem:[#allocation8 + $0xc8] sm:$0xff] %v262_v41  ;;  %v265_v44 = vpop.f32.mrb[14].mxu0 }
 0x133   :  { %506 = vst [vmem:[#allocation8 + $0xd8] sm:$0xff] %v423_v43  ;;  %v266_v45 = vadd.f32 %v265_v44, %v844_v48  ;;  %v426_v46 = vpop.f32.mrb[14].mxu1  ;;  %v267_v47 = vpop.f32.mrb[15].mxu0 }
 0x134   :  { %v427_v52 = vadd.f32 %v426_v46, %v846_v49  ;;  %v268_v53 = vadd.f32 %v267_v47, %v848_v50  ;;  %v428_v54 = vpop.f32.mrb[15].mxu1 }
 0x135   :  { %507 = vst [vmem:[#allocation8 + $0xe0] sm:$0xff] %v266_v45  ;;  %v429_v55 = vadd.f32 %v428_v54, %v850_v51 }
 0x136   :  { %509 = vst [vmem:[#allocation8 + $0xf0] sm:$0xff] %v427_v52  ;;  %508 = vst [vmem:[#allocation8 + $0xe8] sm:$0xff] %v268_v53  ;;  %v271_v56 = vpop.f32.mrb[16].mxu0 }
 0x137   :  { %510 = vst [vmem:[#allocation8 + $0xf8] sm:$0xff] %v429_v55  ;;  %v272_v57 = vadd.f32 %v271_v56, %v844_v48  ;;  %v432_v58 = vpop.f32.mrb[16].mxu1  ;;  %v273_v59 = vpop.f32.mrb[17].mxu0 }
 0x138   :  { %v433_v60 = vadd.f32 %v432_v58, %v846_v49  ;;  %v274_v61 = vadd.f32 %v273_v59, %v848_v50  ;;  %v434_v62 = vpop.f32.mrb[17].mxu1 }
 0x139   :  { %511 = vst [vmem:[#allocation8 + $0x100] sm:$0xff] %v272_v57  ;;  %v435_v63 = vadd.f32 %v434_v62, %v850_v51 }
 0x13a   :  { %513 = vst [vmem:[#allocation8 + $0x110] sm:$0xff] %v433_v60  ;;  %512 = vst [vmem:[#allocation8 + $0x108] sm:$0xff] %v274_v61  ;;  %v277_v0 = vpop.f32.mrb[18].mxu0 }
 0x13b   :  { %514 = vst [vmem:[#allocation8 + $0x118] sm:$0xff] %v435_v63  ;;  %v278_v1 = vadd.f32 %v277_v0, %v844_v48  ;;  %v438_v2 = vpop.f32.mrb[18].mxu1  ;;  %v279_v3 = vpop.f32.mrb[19].mxu0 }
 0x13c   :  { %v439_v4 = vadd.f32 %v438_v2, %v846_v49  ;;  %v280_v5 = vadd.f32 %v279_v3, %v848_v50  ;;  %v440_v6 = vpop.f32.mrb[19].mxu1 }
 0x13d   :  { %515 = vst [vmem:[#allocation8 + $0x120] sm:$0xff] %v278_v1  ;;  %v441_v7 = vadd.f32 %v440_v6, %v850_v51 }
 0x13e   :  { %517 = vst [vmem:[#allocation8 + $0x130] sm:$0xff] %v439_v4  ;;  %516 = vst [vmem:[#allocation8 + $0x128] sm:$0xff] %v280_v5  ;;  %v283_v8 = vpop.f32.mrb[20].mxu0 }
 0x13f   :  { %518 = vst [vmem:[#allocation8 + $0x138] sm:$0xff] %v441_v7  ;;  %v284_v9 = vadd.f32 %v283_v8, %v844_v48  ;;  %v444_v10 = vpop.f32.mrb[20].mxu1  ;;  %v285_v11 = vpop.f32.mrb[21].mxu0 }
 0x140   :  { %v445_v12 = vadd.f32 %v444_v10, %v846_v49  ;;  %v286_v13 = vadd.f32 %v285_v11, %v848_v50  ;;  %v446_v14 = vpop.f32.mrb[21].mxu1 }
 0x141   :  { %519 = vst [vmem:[#allocation8 + $0x140] sm:$0xff] %v284_v9  ;;  %v447_v15 = vadd.f32 %v446_v14, %v850_v51 }
 0x142   :  { %521 = vst [vmem:[#allocation8 + $0x150] sm:$0xff] %v445_v12  ;;  %520 = vst [vmem:[#allocation8 + $0x148] sm:$0xff] %v286_v13  ;;  %v289_v16 = vpop.f32.mrb[22].mxu0 }
 0x143   :  { %522 = vst [vmem:[#allocation8 + $0x158] sm:$0xff] %v447_v15  ;;  %v290_v17 = vadd.f32 %v289_v16, %v844_v48  ;;  %v450_v18 = vpop.f32.mrb[22].mxu1  ;;  %v291_v19 = vpop.f32.mrb[23].mxu0 }
 0x144   :  { %v451_v20 = vadd.f32 %v450_v18, %v846_v49  ;;  %v292_v21 = vadd.f32 %v291_v19, %v848_v50  ;;  %v452_v22 = vpop.f32.mrb[23].mxu1 }
 0x145   :  { %523 = vst [vmem:[#allocation8 + $0x160] sm:$0xff] %v290_v17  ;;  %v453_v23 = vadd.f32 %v452_v22, %v850_v51 }
 0x146   :  { %525 = vst [vmem:[#allocation8 + $0x170] sm:$0xff] %v451_v20  ;;  %524 = vst [vmem:[#allocation8 + $0x168] sm:$0xff] %v292_v21  ;;  %v295_v24 = vpop.f32.mrb[24].mxu0 }
 0x147   :  { %526 = vst [vmem:[#allocation8 + $0x178] sm:$0xff] %v453_v23  ;;  %v296_v25 = vadd.f32 %v295_v24, %v844_v48  ;;  %v456_v26 = vpop.f32.mrb[24].mxu1  ;;  %v297_v27 = vpop.f32.mrb[25].mxu0 }
 0x148   :  { %v457_v28 = vadd.f32 %v456_v26, %v846_v49  ;;  %v298_v29 = vadd.f32 %v297_v27, %v848_v50  ;;  %v458_v30 = vpop.f32.mrb[25].mxu1 }
 0x149   :  { %527 = vst [vmem:[#allocation8 + $0x180] sm:$0xff] %v296_v25  ;;  %v459_v31 = vadd.f32 %v458_v30, %v850_v51 }
 0x14a   :  { %529 = vst [vmem:[#allocation8 + $0x190] sm:$0xff] %v457_v28  ;;  %528 = vst [vmem:[#allocation8 + $0x188] sm:$0xff] %v298_v29  ;;  %v301_v32 = vpop.f32.mrb[26].mxu0 }
 0x14b   :  { %530 = vst [vmem:[#allocation8 + $0x198] sm:$0xff] %v459_v31  ;;  %v302_v33 = vadd.f32 %v301_v32, %v844_v48  ;;  %v462_v34 = vpop.f32.mrb[26].mxu1  ;;  %v303_v35 = vpop.f32.mrb[27].mxu0 }
 0x14c   :  { %v463_v36 = vadd.f32 %v462_v34, %v846_v49  ;;  %v304_v37 = vadd.f32 %v303_v35, %v848_v50  ;;  %v464_v38 = vpop.f32.mrb[27].mxu1 }
 0x14d   :  { %531 = vst [vmem:[#allocation8 + $0x1a0] sm:$0xff] %v302_v33  ;;  %v465_v39 = vadd.f32 %v464_v38, %v850_v51 }
 0x14e   :  { %533 = vst [vmem:[#allocation8 + $0x1b0] sm:$0xff] %v463_v36  ;;  %532 = vst [vmem:[#allocation8 + $0x1a8] sm:$0xff] %v304_v37  ;;  %v307_v40 = vpop.f32.mrb[28].mxu0 }
 0x14f   :  { %534 = vst [vmem:[#allocation8 + $0x1b8] sm:$0xff] %v465_v39  ;;  %v308_v41 = vadd.f32 %v307_v40, %v844_v48  ;;  %v468_v42 = vpop.f32.mrb[28].mxu1  ;;  %v309_v43 = vpop.f32.mrb[29].mxu0 }
 0x150   :  { %v469_v44 = vadd.f32 %v468_v42, %v846_v49  ;;  %v310_v45 = vadd.f32 %v309_v43, %v848_v50  ;;  %v470_v46 = vpop.f32.mrb[29].mxu1 }
 0x151   :  { %535 = vst [vmem:[#allocation8 + $0x1c0] sm:$0xff] %v308_v41  ;;  %v471_v47 = vadd.f32 %v470_v46, %v850_v51 }
 0x152   :  { %537 = vst [vmem:[#allocation8 + $0x1d0] sm:$0xff] %v469_v44  ;;  %536 = vst [vmem:[#allocation8 + $0x1c8] sm:$0xff] %v310_v45  ;;  %v313_v52 = vpop.f32.mrb[30].mxu0 }
 0x153   :  { %538 = vst [vmem:[#allocation8 + $0x1d8] sm:$0xff] %v471_v47  ;;  %v314_v53 = vadd.f32 %v313_v52, %v844_v48  ;;  %v474_v54 = vpop.f32.mrb[30].mxu1  ;;  %v315_v55 = vpop.f32.mrb[31].mxu0 }
 0x154   :  { %v475_v56 = vadd.f32 %v474_v54, %v846_v49  ;;  %v316_v57 = vadd.f32 %v315_v55, %v848_v50  ;;  %v476_v58 = vpop.f32.mrb[31].mxu1 }
 0x155   :  { %539 = vst [vmem:[#allocation8 + $0x1e0] sm:$0xff] %v314_v53  ;;  %v477_v59 = vadd.f32 %v476_v58, %v850_v51 }
 0x156   :  { %541 = vst [vmem:[#allocation8 + $0x1f0] sm:$0xff] %v475_v56  ;;  %540 = vst [vmem:[#allocation8 + $0x1e8] sm:$0xff] %v316_v57 }
 0x157   :  { %542 = vst [vmem:[#allocation8 + $0x1f8] sm:$0xff] %v477_v59 }
 0x158   :  { %695 = shalt.err (!%p692_p0)
}
 0x159   :  { %s696_s29 = scalar_lea.hbm %s934_s3, 8192 }
 0x15a   :  { %p697_p1 = scmp.ne.s32.totalorder %s934_s3, %s696_s29  ;;  %p700_p2 = scmp.lt.u32.totalorder %s696_s29, %s934_s3 }
 0x15c   :  { %p702_p3 = pnand %p700_p2, %p697_p1 }
 0x15e   :  { %705 = shalt.err (!%p702_p3)
}
 0x15f   :  { %554 = dma.vmem_to_hbm [thread:$0]  %s549_s25, 8192, %s934_s3, [#allocation4], %s713_s22, %s713_s22, %s714_s23  }
 0x160   :  { %710 = dma.done.wait [#allocation4], 8192  }
 0x161   :  { %711 = vsyncadd [#allocation4], 4294959104 }
 0x162   :  { %558 = vsyncpa [#allocation3], 1 }
 0x163   :  { %559 = vsyncpa [#allocation6], 1 }
 0x164   :  { %560 = vsyncpa [#allocation4], 1 }

</bundles_post_ra>
